<compile_context>
chip_gen: v7x
topology: tpu7x:2x2x1
jax: 0.10.0
libtpu: 0.0.40
codegen_flags: <defaults>
</compile_context>

<pallas_src>
import functools

import jax
import jax.numpy as jnp
from jax.experimental import pallas as pl
from jax.experimental.pallas import tpu as pltpu


# ---------------------------------------------------------------------------
# Fused kernel: conv1+bn1+relu -> conv2+bn2+relu -> fc(+relu, chunked over the
# grid) -> head+softmax.  One grid step per fc-weight chunk.
# ---------------------------------------------------------------------------
def _tac_policy_fused_kernel(patches_ref, w1_ref, b1_ref, w2_ref, b2_ref,
                             fcw_ref, fcb_ref, hw_ref, hb_ref, o_ref,
                             h2_scr, acc_scr):
    """Grid step k of G.

    step 0      : conv1+bn1+relu, conv2+bn2+relu, relayout conv2 output into
                  h2_scr (batch rows, fc-input column order), zero acc.
    every step  : acc += h2_scr[k] @ fcw_chunk_k           (K = 2048 // G)
    step G-1    : h3 = relu(acc + fcb); probs = softmax(h3 @ hw + hb)
    """
    k = pl.program_id(0)
    G, N, Kc = h2_scr.shape          # (chunks, batch, fc-K per chunk)
    Pg = Kc // 64                    # conv2 spatial positions per chunk
    P = G * Pg                       # total conv2 spatial positions (== 32)

    @pl.when(k == 0)
    def _():
        # conv1 + bn1 + relu (BN folded into w1/b1): (P*N,16)@(16,128).
        h1 = jnp.dot(patches_ref[...], w1_ref[...],
                     preferred_element_type=jnp.float32)
        h1 = jnp.maximum(h1 + b1_ref[...], 0.0).astype(jnp.bfloat16)

        # conv2 + bn2 + relu (BN folded into w2/b2): (P*N,128)@(128,64).
        h2 = jnp.dot(h1, w2_ref[...], preferred_element_type=jnp.float32)
        h2 = jnp.maximum(h2 + b2_ref[...], 0.0).astype(jnp.bfloat16)

        # Relayout conv2 output (spatial-major rows m = p*N + n) into the fc
        # input layout: h2_scr[g, n, p_local*64 + c] = conv2[n, c, p] with
        # p = g*Pg + p_local.  32 small static stores (no MXU, no reshape).
        for p in range(P):
            g, ploc = p // Pg, p % Pg
            h2_scr[g, :, ploc * 64:(ploc + 1) * 64] = h2[p * N:(p + 1) * N, :]

        acc_scr[...] = jnp.zeros_like(acc_scr)

    # fc chunk k: (N, Kc) @ (Kc, 512), accumulated in f32 across the grid.
    acc_scr[...] += jnp.dot(h2_scr[k], fcw_ref[...],
                            preferred_element_type=jnp.float32)

    @pl.when(k == G - 1)
    def _():
        h3 = jnp.maximum(acc_scr[...] + fcb_ref[...], 0.0).astype(jnp.bfloat16)
        # head + softmax(dim=1); padded logit columns carry a -1e30 bias -> 0.
        logits = jnp.dot(h3, hw_ref[...],
                         preferred_element_type=jnp.float32) + hb_ref[...]
        m = jnp.max(logits, axis=-1, keepdims=True)
        e = jnp.exp(logits - m)
        o_ref[...] = e / jnp.sum(e, axis=-1, keepdims=True)   # exact softmax


# ---------------------------------------------------------------------------
# Parameters (PyTorch layout) + one-time prep (BN fold, pack, permute, bf16)
# ---------------------------------------------------------------------------
def init_params(key, action_size):
    ks = jax.random.split(key, 16)
    f32 = jnp.float32

    def rn(k, shape, s=0.05):
        return jax.random.normal(k, shape, dtype=f32) * s

    return {
        "conv1_w": rn(ks[0], (32, 1, 2, 2)),
        "conv1_b": rn(ks[1], (32,)),
        "bn1_gamma": 1.0 + rn(ks[2], (32,)),
        "bn1_beta": rn(ks[3], (32,)),
        "bn1_mean": rn(ks[4], (32,)),
        "bn1_var": 0.5 + jnp.abs(rn(ks[5], (32,))),
        "conv2_w": rn(ks[6], (64, 32, 2, 2)),
        "conv2_b": rn(ks[7], (64,)),
        "bn2_gamma": 1.0 + rn(ks[8], (64,)),
        "bn2_beta": rn(ks[9], (64,)),
        "bn2_mean": rn(ks[10], (64,)),
        "bn2_var": 0.5 + jnp.abs(rn(ks[11], (64,))),
        "fc_w": rn(ks[12], (512, 2048)),     # PyTorch Linear: (out, in)
        "fc_b": rn(ks[13], (512,)),
        "head_w": rn(ks[14], (action_size, 512)),
        "head_b": rn(ks[15], (action_size,)),
    }


def prepare_params(params, eps=1e-5):
    """One-time (outside jit) weight packing: BN fold, conv->matmul packing,
    fc flatten-permutation (to a (2048, 512) streaming layout), head padding,
    bf16 casts."""
    s1 = params["bn1_gamma"] / jnp.sqrt(params["bn1_var"] + eps)
    t1 = params["bn1_beta"] - params["bn1_mean"] * s1
    s2 = params["bn2_gamma"] / jnp.sqrt(params["bn2_var"] + eps)
    t2 = params["bn2_beta"] - params["bn2_mean"] * s2

    # conv1 folded weight, replicated over the 4 conv1-output positions inside
    # a 4x4 input patch: W1big[r*4 + s, (a*2+b)*32 + c]
    w1 = params["conv1_w"][:, 0, :, :] * s1[:, None, None]          # (32,2,2)
    w1big = jnp.zeros((16, 128), jnp.float32)
    for a in range(2):
        for b in range(2):
            for kh in range(2):
                for kw in range(2):
                    row = (2 * a + kh) * 4 + (2 * b + kw)
                    col = (a * 2 + b) * 32
                    w1big = w1big.at[row, col:col + 32].set(w1[:, kh, kw])
    b1big = jnp.tile(params["conv1_b"] * s1 + t1, 4)                 # (128,)

    # conv2 folded weight: W2big[(kh*2+kw)*32 + ic, oc]
    w2big = (params["conv2_w"] * s2[:, None, None, None]
             ).transpose(2, 3, 1, 0).reshape(128, 64)
    b2f = params["conv2_b"] * s2 + t2                                # (64,)

    # fc weight permuted so row j = p*64 + c matches fc_w[o, c*P + p]
    # (PyTorch NCHW flatten), flattened to a streamable (2048, 512) layout.
    P = 2048 // 64
    fcw = (params["fc_w"].reshape(512, 64, P)
           .transpose(2, 1, 0).reshape(P * 64, 512))                 # (2048,512)

    # head: transpose + pad to a lane-dense multiple of 128 columns
    a_sz = params["head_w"].shape[0]
    apad = ((a_sz + 127) // 128) * 128
    hw = jnp.zeros((512, apad), jnp.float32).at[:, :a_sz].set(params["head_w"].T)
    hb = jnp.full((apad,), -1e30, jnp.float32).at[:a_sz].set(params["head_b"])

    return {
        "w1": w1big.astype(jnp.bfloat16),
        "b1": b1big.reshape(1, 128).astype(jnp.float32),
        "w2": w2big.astype(jnp.bfloat16),
        "b2": b2f.reshape(1, 64).astype(jnp.float32),
        "fcw": fcw.astype(jnp.bfloat16),
        "fcb": params["fc_b"].reshape(1, 512).astype(jnp.float32),
        "hw": hw.astype(jnp.bfloat16),
        "hb": hb.reshape(1, apad).astype(jnp.float32),
    }


# ---------------------------------------------------------------------------
# Forward
# ---------------------------------------------------------------------------
def tac_policy_forward(x, prepped, action_size, grid_chunks=4):
    """x: (N, 1, H, W) float32 NCHW; requires 64*(H//4)*(W//4) == 2048.

    grid_chunks: number of fc-weight DMA chunks (grid steps).  4 (512 KB
    chunks) is a good cross-generation default and respects v7x guidance;
    use 8 on v5e/v6e when tuning per chip.
    """
    N, C, H, W = x.shape
    assert C == 1
    H2, W2 = H // 4, W // 4
    P = H2 * W2
    assert 64 * P == 2048, "input spatial size must flatten to 2048 after conv2"
    G = grid_chunks
    assert P % G == 0 and 2048 % G == 0
    Kc = 2048 // G

    # Space-to-depth: one 4x4 input patch per conv2 output pixel.
    # Row order is spatial-major / batch-minor: m = p*N + n, feature = r*4 + s.
    patches = (x.reshape(N, H2, 4, W2, 4)
                 .transpose(1, 3, 0, 2, 4)
                 .reshape(P * N, 16)
                 .astype(jnp.bfloat16))

    apad = prepped["hb"].shape[1]
    probs_pad = pl.pallas_call(
        _tac_policy_fused_kernel,
        out_shape=jax.ShapeDtypeStruct((N, apad), jnp.float32),
        grid=(G,),
        in_specs=[
            pl.BlockSpec((P * N, 16), lambda k: (0, 0)),     # patches (resident)
            pl.BlockSpec((16, 128), lambda k: (0, 0)),       # conv1 weight
            pl.BlockSpec((1, 128), lambda k: (0, 0)),        # conv1 bias
            pl.BlockSpec((128, 64), lambda k: (0, 0)),       # conv2 weight
            pl.BlockSpec((1, 64), lambda k: (0, 0)),         # conv2 bias
            pl.BlockSpec((Kc, 512), lambda k: (k, 0)),       # fc weight: streamed
            pl.BlockSpec((1, 512), lambda k: (0, 0)),        # fc bias
            pl.BlockSpec((512, apad), lambda k: (0, 0)),     # head weight
            pl.BlockSpec((1, apad), lambda k: (0, 0)),       # head bias
        ],
        out_specs=pl.BlockSpec((N, apad), lambda k: (0, 0)),
        scratch_shapes=[
            pltpu.VMEM((G, N, Kc), jnp.bfloat16),   # relayouted conv2 output
            pltpu.VMEM((N, 512), jnp.float32),      # fc accumulator
        ],
        compiler_params=pltpu.CompilerParams(
            dimension_semantics=("arbitrary",)),
    )(patches, prepped["w1"], prepped["b1"], prepped["w2"], prepped["b2"],
      prepped["fcw"], prepped["fcb"], prepped["hw"], prepped["hb"])

    return probs_pad[:, :action_size]


# ---------------------------------------------------------------------------
# Pure-JAX f32 reference (mirrors the PyTorch module, eval-mode BN)
# ---------------------------------------------------------------------------
def tac_policy_reference(x, params, eps=1e-5):
    N = x.shape[0]
    dn = ("NCHW", "OIHW", "NCHW")
    y = jax.lax.conv_general_dilated(x, params["conv1_w"], (2, 2), "VALID",
                                     dimension_numbers=dn)
    y = y + params["conv1_b"][None, :, None, None]
    s1 = params["bn1_gamma"] / jnp.sqrt(params["bn1_var"] + eps)
    t1 = params["bn1_beta"] - params["bn1_mean"] * s1
    y = jnp.maximum(y * s1[None, :, None, None] + t1[None, :, None, None], 0.0)
    y = jax.lax.conv_general_dilated(y, params["conv2_w"], (2, 2), "VALID",
                                     dimension_numbers=dn)
    y = y + params["conv2_b"][None, :, None, None]
    s2 = params["bn2_gamma"] / jnp.sqrt(params["bn2_var"] + eps)
    t2 = params["bn2_beta"] - params["bn2_mean"] * s2
    y = jnp.maximum(y * s2[None, :, None, None] + t2[None, :, None, None], 0.0)
    flat = y.reshape(N, -1)
    h3 = jnp.maximum(flat @ params["fc_w"].T + params["fc_b"], 0.0)
    logits = h3 @ params["head_w"].T + params["head_b"]
    return jax.nn.softmax(logits, axis=1)


# ---------------------------------------------------------------------------
if __name__ == "__main__":
    ACTION_SIZE = 10
    key = jax.random.PRNGKey(0)
    k_params, k_x = jax.random.split(key)

    params = init_params(k_params, ACTION_SIZE)
    prepped = prepare_params(params)   # one-time, outside the jit hot path

    # Input: batch=2, 1 channel, 16x32 spatial -> conv2 output 64*4*8 = 2048.
    x = jax.random.normal(k_x, (2, 1, 16, 32), dtype=jnp.float32)

    fwd = jax.jit(functools.partial(tac_policy_forward,
                                    action_size=ACTION_SIZE))
    probs = fwd(x, prepped)
    jax.block_until_ready(probs)

    ref = tac_policy_reference(x, params)

    assert probs.shape == (2, ACTION_SIZE)
    assert bool(jnp.all(jnp.isfinite(probs)))
    assert bool(jnp.allclose(jnp.sum(probs, axis=1), 1.0, atol=1e-3))
    assert bool(jnp.allclose(probs, ref, atol=2e-2)), (
        "max abs err vs reference = "
        f"{float(jnp.max(jnp.abs(probs - ref)))}")
    print("KERNEL_OK")
</pallas_src>

<mosaic_0001>
module attributes {stable_mosaic.version = 11 : i64} {
  func.func @_tac_policy_fused_kernel(%arg0: i32, %arg1: memref<64x16xbf16, #tpu.memory_space<vmem>>, %arg2: memref<16x128xbf16, #tpu.memory_space<vmem>>, %arg3: memref<1x128xf32, #tpu.memory_space<vmem>>, %arg4: memref<128x64xbf16, #tpu.memory_space<vmem>>, %arg5: memref<1x64xf32, #tpu.memory_space<vmem>>, %arg6: memref<512x512xbf16, #tpu.memory_space<vmem>>, %arg7: memref<1x512xf32, #tpu.memory_space<vmem>>, %arg8: memref<512x128xbf16, #tpu.memory_space<vmem>>, %arg9: memref<1x128xf32, #tpu.memory_space<vmem>>, %arg10: memref<2x128xf32, #tpu.memory_space<vmem>>, %arg11: memref<4x2x512xbf16, #tpu.memory_space<vmem>>, %arg12: memref<2x512xf32, #tpu.memory_space<vmem>>) attributes {dimension_semantics = [#tpu.dimension_semantics<arbitrary>], iteration_bounds = array<i64: 4>, scalar_prefetch = 0 : i64, scratch_operands = 2 : i64, tpu.core_type = #tpu.core_type<tc>, window_params = [{pipeline_mode = #tpu.pipeline_mode<synchronous>, transform_indices = @transform_0, window_bounds = array<i64: 64, 16>}, {pipeline_mode = #tpu.pipeline_mode<synchronous>, transform_indices = @transform_1, window_bounds = array<i64: 16, 128>}, {pipeline_mode = #tpu.pipeline_mode<synchronous>, transform_indices = @transform_2, window_bounds = array<i64: 1, 128>}, {pipeline_mode = #tpu.pipeline_mode<synchronous>, transform_indices = @transform_3, window_bounds = array<i64: 128, 64>}, {pipeline_mode = #tpu.pipeline_mode<synchronous>, transform_indices = @transform_4, window_bounds = array<i64: 1, 64>}, {transform_indices = @transform_5, window_bounds = array<i64: 512, 512>}, {pipeline_mode = #tpu.pipeline_mode<synchronous>, transform_indices = @transform_6, window_bounds = array<i64: 1, 512>}, {pipeline_mode = #tpu.pipeline_mode<synchronous>, transform_indices = @transform_7, window_bounds = array<i64: 512, 128>}, {pipeline_mode = #tpu.pipeline_mode<synchronous>, transform_indices = @transform_8, window_bounds = array<i64: 1, 128>}, {pipeline_mode = #tpu.pipeline_mode<synchronous>, transform_indices = @transform_9, window_bounds = array<i64: 2, 128>}]} {
    %c0_i32 = arith.constant 0 : i32
    %0 = arith.cmpi eq, %arg0, %c0_i32 : i32
    %1 = arith.extui %0 : i1 to i32
    %c0_i32_0 = arith.constant 0 : i32
    %2 = arith.cmpi ne, %1, %c0_i32_0 : i32
    scf.if %2 {
      %c0_9 = arith.constant 0 : index
      %c0_10 = arith.constant 0 : index
      %14 = vector.load %arg1[%c0_9, %c0_10] : memref<64x16xbf16, #tpu.memory_space<vmem>>, vector<64x16xbf16>
      %c0_11 = arith.constant 0 : index
      %c0_12 = arith.constant 0 : index
      %15 = vector.load %arg2[%c0_11, %c0_12] : memref<16x128xbf16, #tpu.memory_space<vmem>>, vector<16x128xbf16>
      %cst_13 = arith.constant dense<0.000000e+00> : vector<64x128xf32>
      %16 = tpu.matmul %14, %15, %cst_13 {dimension_numbers = #tpu.dot_dimension_numbers<[1], [0], [0], [1], [0, 0, 1, 1], [], []>} : vector<64x16xbf16>, vector<16x128xbf16>, vector<64x128xf32> -> vector<64x128xf32>
      %c0_14 = arith.constant 0 : index
      %c0_15 = arith.constant 0 : index
      %17 = vector.load %arg3[%c0_14, %c0_15] : memref<1x128xf32, #tpu.memory_space<vmem>>, vector<1x128xf32>
      %18 = vector.broadcast %17 : vector<1x128xf32> to vector<64x128xf32>
      %19 = arith.addf %16, %18 : vector<64x128xf32>
      %cst_16 = arith.constant 0.000000e+00 : f32
      %20 = vector.broadcast %cst_16 : f32 to vector<64x128xf32>
      %21 = arith.maximumf %19, %20 : vector<64x128xf32>
      %22 = arith.truncf %21 : vector<64x128xf32> to vector<64x128xbf16>
      %c0_17 = arith.constant 0 : index
      %c0_18 = arith.constant 0 : index
      %23 = vector.load %arg4[%c0_17, %c0_18] : memref<128x64xbf16, #tpu.memory_space<vmem>>, vector<128x64xbf16>
      %cst_19 = arith.constant dense<0.000000e+00> : vector<64x64xf32>
      %24 = tpu.matmul %22, %23, %cst_19 {dimension_numbers = #tpu.dot_dimension_numbers<[1], [0], [0], [1], [0, 0, 1, 1], [], []>} : vector<64x128xbf16>, vector<128x64xbf16>, vector<64x64xf32> -> vector<64x64xf32>
      %c0_20 = arith.constant 0 : index
      %c0_21 = arith.constant 0 : index
      %25 = vector.load %arg5[%c0_20, %c0_21] : memref<1x64xf32, #tpu.memory_space<vmem>>, vector<1x64xf32>
      %26 = vector.broadcast %25 : vector<1x64xf32> to vector<64x64xf32>
      %27 = arith.addf %24, %26 : vector<64x64xf32>
      %cst_22 = arith.constant 0.000000e+00 : f32
      %28 = vector.broadcast %cst_22 : f32 to vector<64x64xf32>
      %29 = arith.maximumf %27, %28 : vector<64x64xf32>
      %30 = arith.truncf %29 : vector<64x64xf32> to vector<64x64xbf16>
      %31 = vector.extract_strided_slice %30 {offsets = [0, 0], sizes = [2, 64], strides = [1, 1]} : vector<64x64xbf16> to vector<2x64xbf16>
      %c0_23 = arith.constant 0 : index
      %c0_24 = arith.constant 0 : index
      %c0_25 = arith.constant 0 : index
      %32 = vector.load %arg11[%c0_23, %c0_24, %c0_25] : memref<4x2x512xbf16, #tpu.memory_space<vmem>>, vector<1x2x64xbf16>
      %33 = vector.shape_cast %32 : vector<1x2x64xbf16> to vector<2x64xbf16>
      %34 = vector.shape_cast %31 : vector<2x64xbf16> to vector<1x2x64xbf16>
      tpu.vector_store %arg11[%c0_23, %c0_24, %c0_25], %34 {strides = array<i32>} : memref<4x2x512xbf16, #tpu.memory_space<vmem>>, vector<1x2x64xbf16>,
      %35 = vector.extract_strided_slice %30 {offsets = [2, 0], sizes = [2, 64], strides = [1, 1]} : vector<64x64xbf16> to vector<2x64xbf16>
      %c0_26 = arith.constant 0 : index
      %c0_27 = arith.constant 0 : index
      %c64 = arith.constant 64 : index
      %36 = vector.load %arg11[%c0_26, %c0_27, %c64] : memref<4x2x512xbf16, #tpu.memory_space<vmem>>, vector<1x2x64xbf16>
      %37 = vector.shape_cast %36 : vector<1x2x64xbf16> to vector<2x64xbf16>
      %38 = vector.shape_cast %35 : vector<2x64xbf16> to vector<1x2x64xbf16>
      tpu.vector_store %arg11[%c0_26, %c0_27, %c64], %38 {strides = array<i32>} : memref<4x2x512xbf16, #tpu.memory_space<vmem>>, vector<1x2x64xbf16>,
      %39 = vector.extract_strided_slice %30 {offsets = [4, 0], sizes = [2, 64], strides = [1, 1]} : vector<64x64xbf16> to vector<2x64xbf16>
      %c0_28 = arith.constant 0 : index
      %c0_29 = arith.constant 0 : index
      %c128 = arith.constant 128 : index
      %40 = vector.load %arg11[%c0_28, %c0_29, %c128] : memref<4x2x512xbf16, #tpu.memory_space<vmem>>, vector<1x2x64xbf16>
      %41 = vector.shape_cast %40 : vector<1x2x64xbf16> to vector<2x64xbf16>
      %42 = vector.shape_cast %39 : vector<2x64xbf16> to vector<1x2x64xbf16>
      tpu.vector_store %arg11[%c0_28, %c0_29, %c128], %42 {strides = array<i32>} : memref<4x2x512xbf16, #tpu.memory_space<vmem>>, vector<1x2x64xbf16>,
      %43 = vector.extract_strided_slice %30 {offsets = [6, 0], sizes = [2, 64], strides = [1, 1]} : vector<64x64xbf16> to vector<2x64xbf16>
      %c0_30 = arith.constant 0 : index
      %c0_31 = arith.constant 0 : index
      %c192 = arith.constant 192 : index
      %44 = vector.load %arg11[%c0_30, %c0_31, %c192] : memref<4x2x512xbf16, #tpu.memory_space<vmem>>, vector<1x2x64xbf16>
      %45 = vector.shape_cast %44 : vector<1x2x64xbf16> to vector<2x64xbf16>
      %46 = vector.shape_cast %43 : vector<2x64xbf16> to vector<1x2x64xbf16>
      tpu.vector_store %arg11[%c0_30, %c0_31, %c192], %46 {strides = array<i32>} : memref<4x2x512xbf16, #tpu.memory_space<vmem>>, vector<1x2x64xbf16>,
      %47 = vector.extract_strided_slice %30 {offsets = [8, 0], sizes = [2, 64], strides = [1, 1]} : vector<64x64xbf16> to vector<2x64xbf16>
      %c0_32 = arith.constant 0 : index
      %c0_33 = arith.constant 0 : index
      %c256 = arith.constant 256 : index
      %48 = vector.load %arg11[%c0_32, %c0_33, %c256] : memref<4x2x512xbf16, #tpu.memory_space<vmem>>, vector<1x2x64xbf16>
      %49 = vector.shape_cast %48 : vector<1x2x64xbf16> to vector<2x64xbf16>
      %50 = vector.shape_cast %47 : vector<2x64xbf16> to vector<1x2x64xbf16>
      tpu.vector_store %arg11[%c0_32, %c0_33, %c256], %50 {strides = array<i32>} : memref<4x2x512xbf16, #tpu.memory_space<vmem>>, vector<1x2x64xbf16>,
      %51 = vector.extract_strided_slice %30 {offsets = [10, 0], sizes = [2, 64], strides = [1, 1]} : vector<64x64xbf16> to vector<2x64xbf16>
      %c0_34 = arith.constant 0 : index
      %c0_35 = arith.constant 0 : index
      %c320 = arith.constant 320 : index
      %52 = vector.load %arg11[%c0_34, %c0_35, %c320] : memref<4x2x512xbf16, #tpu.memory_space<vmem>>, vector<1x2x64xbf16>
      %53 = vector.shape_cast %52 : vector<1x2x64xbf16> to vector<2x64xbf16>
      %54 = vector.shape_cast %51 : vector<2x64xbf16> to vector<1x2x64xbf16>
      tpu.vector_store %arg11[%c0_34, %c0_35, %c320], %54 {strides = array<i32>} : memref<4x2x512xbf16, #tpu.memory_space<vmem>>, vector<1x2x64xbf16>,
      %55 = vector.extract_strided_slice %30 {offsets = [12, 0], sizes = [2, 64], strides = [1, 1]} : vector<64x64xbf16> to vector<2x64xbf16>
      %c0_36 = arith.constant 0 : index
      %c0_37 = arith.constant 0 : index
      %c384 = arith.constant 384 : index
      %56 = vector.load %arg11[%c0_36, %c0_37, %c384] : memref<4x2x512xbf16, #tpu.memory_space<vmem>>, vector<1x2x64xbf16>
      %57 = vector.shape_cast %56 : vector<1x2x64xbf16> to vector<2x64xbf16>
      %58 = vector.shape_cast %55 : vector<2x64xbf16> to vector<1x2x64xbf16>
      tpu.vector_store %arg11[%c0_36, %c0_37, %c384], %58 {strides = array<i32>} : memref<4x2x512xbf16, #tpu.memory_space<vmem>>, vector<1x2x64xbf16>,
      %59 = vector.extract_strided_slice %30 {offsets = [14, 0], sizes = [2, 64], strides = [1, 1]} : vector<64x64xbf16> to vector<2x64xbf16>
      %c0_38 = arith.constant 0 : index
      %c0_39 = arith.constant 0 : index
      %c448 = arith.constant 448 : index
      %60 = vector.load %arg11[%c0_38, %c0_39, %c448] : memref<4x2x512xbf16, #tpu.memory_space<vmem>>, vector<1x2x64xbf16>
      %61 = vector.shape_cast %60 : vector<1x2x64xbf16> to vector<2x64xbf16>
      %62 = vector.shape_cast %59 : vector<2x64xbf16> to vector<1x2x64xbf16>
      tpu.vector_store %arg11[%c0_38, %c0_39, %c448], %62 {strides = array<i32>} : memref<4x2x512xbf16, #tpu.memory_space<vmem>>, vector<1x2x64xbf16>,
      %63 = vector.extract_strided_slice %30 {offsets = [16, 0], sizes = [2, 64], strides = [1, 1]} : vector<64x64xbf16> to vector<2x64xbf16>
      %c1 = arith.constant 1 : index
      %c0_40 = arith.constant 0 : index
      %c0_41 = arith.constant 0 : index
      %64 = vector.load %arg11[%c1, %c0_40, %c0_41] : memref<4x2x512xbf16, #tpu.memory_space<vmem>>, vector<1x2x64xbf16>
      %65 = vector.shape_cast %64 : vector<1x2x64xbf16> to vector<2x64xbf16>
      %66 = vector.shape_cast %63 : vector<2x64xbf16> to vector<1x2x64xbf16>
      tpu.vector_store %arg11[%c1, %c0_40, %c0_41], %66 {strides = array<i32>} : memref<4x2x512xbf16, #tpu.memory_space<vmem>>, vector<1x2x64xbf16>,
      %67 = vector.extract_strided_slice %30 {offsets = [18, 0], sizes = [2, 64], strides = [1, 1]} : vector<64x64xbf16> to vector<2x64xbf16>
      %c1_42 = arith.constant 1 : index
      %c0_43 = arith.constant 0 : index
      %c64_44 = arith.constant 64 : index
      %68 = vector.load %arg11[%c1_42, %c0_43, %c64_44] : memref<4x2x512xbf16, #tpu.memory_space<vmem>>, vector<1x2x64xbf16>
      %69 = vector.shape_cast %68 : vector<1x2x64xbf16> to vector<2x64xbf16>
      %70 = vector.shape_cast %67 : vector<2x64xbf16> to vector<1x2x64xbf16>
      tpu.vector_store %arg11[%c1_42, %c0_43, %c64_44], %70 {strides = array<i32>} : memref<4x2x512xbf16, #tpu.memory_space<vmem>>, vector<1x2x64xbf16>,
      %71 = vector.extract_strided_slice %30 {offsets = [20, 0], sizes = [2, 64], strides = [1, 1]} : vector<64x64xbf16> to vector<2x64xbf16>
      %c1_45 = arith.constant 1 : index
      %c0_46 = arith.constant 0 : index
      %c128_47 = arith.constant 128 : index
      %72 = vector.load %arg11[%c1_45, %c0_46, %c128_47] : memref<4x2x512xbf16, #tpu.memory_space<vmem>>, vector<1x2x64xbf16>
      %73 = vector.shape_cast %72 : vector<1x2x64xbf16> to vector<2x64xbf16>
      %74 = vector.shape_cast %71 : vector<2x64xbf16> to vector<1x2x64xbf16>
      tpu.vector_store %arg11[%c1_45, %c0_46, %c128_47], %74 {strides = array<i32>} : memref<4x2x512xbf16, #tpu.memory_space<vmem>>, vector<1x2x64xbf16>,
      %75 = vector.extract_strided_slice %30 {offsets = [22, 0], sizes = [2, 64], strides = [1, 1]} : vector<64x64xbf16> to vector<2x64xbf16>
      %c1_48 = arith.constant 1 : index
      %c0_49 = arith.constant 0 : index
      %c192_50 = arith.constant 192 : index
      %76 = vector.load %arg11[%c1_48, %c0_49, %c192_50] : memref<4x2x512xbf16, #tpu.memory_space<vmem>>, vector<1x2x64xbf16>
      %77 = vector.shape_cast %76 : vector<1x2x64xbf16> to vector<2x64xbf16>
      %78 = vector.shape_cast %75 : vector<2x64xbf16> to vector<1x2x64xbf16>
      tpu.vector_store %arg11[%c1_48, %c0_49, %c192_50], %78 {strides = array<i32>} : memref<4x2x512xbf16, #tpu.memory_space<vmem>>, vector<1x2x64xbf16>,
      %79 = vector.extract_strided_slice %30 {offsets = [24, 0], sizes = [2, 64], strides = [1, 1]} : vector<64x64xbf16> to vector<2x64xbf16>
      %c1_51 = arith.constant 1 : index
      %c0_52 = arith.constant 0 : index
      %c256_53 = arith.constant 256 : index
      %80 = vector.load %arg11[%c1_51, %c0_52, %c256_53] : memref<4x2x512xbf16, #tpu.memory_space<vmem>>, vector<1x2x64xbf16>
      %81 = vector.shape_cast %80 : vector<1x2x64xbf16> to vector<2x64xbf16>
      %82 = vector.shape_cast %79 : vector<2x64xbf16> to vector<1x2x64xbf16>
      tpu.vector_store %arg11[%c1_51, %c0_52, %c256_53], %82 {strides = array<i32>} : memref<4x2x512xbf16, #tpu.memory_space<vmem>>, vector<1x2x64xbf16>,
      %83 = vector.extract_strided_slice %30 {offsets = [26, 0], sizes = [2, 64], strides = [1, 1]} : vector<64x64xbf16> to vector<2x64xbf16>
      %c1_54 = arith.constant 1 : index
      %c0_55 = arith.constant 0 : index
      %c320_56 = arith.constant 320 : index
      %84 = vector.load %arg11[%c1_54, %c0_55, %c320_56] : memref<4x2x512xbf16, #tpu.memory_space<vmem>>, vector<1x2x64xbf16>
      %85 = vector.shape_cast %84 : vector<1x2x64xbf16> to vector<2x64xbf16>
      %86 = vector.shape_cast %83 : vector<2x64xbf16> to vector<1x2x64xbf16>
      tpu.vector_store %arg11[%c1_54, %c0_55, %c320_56], %86 {strides = array<i32>} : memref<4x2x512xbf16, #tpu.memory_space<vmem>>, vector<1x2x64xbf16>,
      %87 = vector.extract_strided_slice %30 {offsets = [28, 0], sizes = [2, 64], strides = [1, 1]} : vector<64x64xbf16> to vector<2x64xbf16>
      %c1_57 = arith.constant 1 : index
      %c0_58 = arith.constant 0 : index
      %c384_59 = arith.constant 384 : index
      %88 = vector.load %arg11[%c1_57, %c0_58, %c384_59] : memref<4x2x512xbf16, #tpu.memory_space<vmem>>, vector<1x2x64xbf16>
      %89 = vector.shape_cast %88 : vector<1x2x64xbf16> to vector<2x64xbf16>
      %90 = vector.shape_cast %87 : vector<2x64xbf16> to vector<1x2x64xbf16>
      tpu.vector_store %arg11[%c1_57, %c0_58, %c384_59], %90 {strides = array<i32>} : memref<4x2x512xbf16, #tpu.memory_space<vmem>>, vector<1x2x64xbf16>,
      %91 = vector.extract_strided_slice %30 {offsets = [30, 0], sizes = [2, 64], strides = [1, 1]} : vector<64x64xbf16> to vector<2x64xbf16>
      %c1_60 = arith.constant 1 : index
      %c0_61 = arith.constant 0 : index
      %c448_62 = arith.constant 448 : index
      %92 = vector.load %arg11[%c1_60, %c0_61, %c448_62] : memref<4x2x512xbf16, #tpu.memory_space<vmem>>, vector<1x2x64xbf16>
      %93 = vector.shape_cast %92 : vector<1x2x64xbf16> to vector<2x64xbf16>
      %94 = vector.shape_cast %91 : vector<2x64xbf16> to vector<1x2x64xbf16>
      tpu.vector_store %arg11[%c1_60, %c0_61, %c448_62], %94 {strides = array<i32>} : memref<4x2x512xbf16, #tpu.memory_space<vmem>>, vector<1x2x64xbf16>,
      %95 = vector.extract_strided_slice %30 {offsets = [32, 0], sizes = [2, 64], strides = [1, 1]} : vector<64x64xbf16> to vector<2x64xbf16>
      %c2 = arith.constant 2 : index
      %c0_63 = arith.constant 0 : index
      %c0_64 = arith.constant 0 : index
      %96 = vector.load %arg11[%c2, %c0_63, %c0_64] : memref<4x2x512xbf16, #tpu.memory_space<vmem>>, vector<1x2x64xbf16>
      %97 = vector.shape_cast %96 : vector<1x2x64xbf16> to vector<2x64xbf16>
      %98 = vector.shape_cast %95 : vector<2x64xbf16> to vector<1x2x64xbf16>
      tpu.vector_store %arg11[%c2, %c0_63, %c0_64], %98 {strides = array<i32>} : memref<4x2x512xbf16, #tpu.memory_space<vmem>>, vector<1x2x64xbf16>,
      %99 = vector.extract_strided_slice %30 {offsets = [34, 0], sizes = [2, 64], strides = [1, 1]} : vector<64x64xbf16> to vector<2x64xbf16>
      %c2_65 = arith.constant 2 : index
      %c0_66 = arith.constant 0 : index
      %c64_67 = arith.constant 64 : index
      %100 = vector.load %arg11[%c2_65, %c0_66, %c64_67] : memref<4x2x512xbf16, #tpu.memory_space<vmem>>, vector<1x2x64xbf16>
      %101 = vector.shape_cast %100 : vector<1x2x64xbf16> to vector<2x64xbf16>
      %102 = vector.shape_cast %99 : vector<2x64xbf16> to vector<1x2x64xbf16>
      tpu.vector_store %arg11[%c2_65, %c0_66, %c64_67], %102 {strides = array<i32>} : memref<4x2x512xbf16, #tpu.memory_space<vmem>>, vector<1x2x64xbf16>,
      %103 = vector.extract_strided_slice %30 {offsets = [36, 0], sizes = [2, 64], strides = [1, 1]} : vector<64x64xbf16> to vector<2x64xbf16>
      %c2_68 = arith.constant 2 : index
      %c0_69 = arith.constant 0 : index
      %c128_70 = arith.constant 128 : index
      %104 = vector.load %arg11[%c2_68, %c0_69, %c128_70] : memref<4x2x512xbf16, #tpu.memory_space<vmem>>, vector<1x2x64xbf16>
      %105 = vector.shape_cast %104 : vector<1x2x64xbf16> to vector<2x64xbf16>
      %106 = vector.shape_cast %103 : vector<2x64xbf16> to vector<1x2x64xbf16>
      tpu.vector_store %arg11[%c2_68, %c0_69, %c128_70], %106 {strides = array<i32>} : memref<4x2x512xbf16, #tpu.memory_space<vmem>>, vector<1x2x64xbf16>,
      %107 = vector.extract_strided_slice %30 {offsets = [38, 0], sizes = [2, 64], strides = [1, 1]} : vector<64x64xbf16> to vector<2x64xbf16>
      %c2_71 = arith.constant 2 : index
      %c0_72 = arith.constant 0 : index
      %c192_73 = arith.constant 192 : index
      %108 = vector.load %arg11[%c2_71, %c0_72, %c192_73] : memref<4x2x512xbf16, #tpu.memory_space<vmem>>, vector<1x2x64xbf16>
      %109 = vector.shape_cast %108 : vector<1x2x64xbf16> to vector<2x64xbf16>
      %110 = vector.shape_cast %107 : vector<2x64xbf16> to vector<1x2x64xbf16>
      tpu.vector_store %arg11[%c2_71, %c0_72, %c192_73], %110 {strides = array<i32>} : memref<4x2x512xbf16, #tpu.memory_space<vmem>>, vector<1x2x64xbf16>,
      %111 = vector.extract_strided_slice %30 {offsets = [40, 0], sizes = [2, 64], strides = [1, 1]} : vector<64x64xbf16> to vector<2x64xbf16>
      %c2_74 = arith.constant 2 : index
      %c0_75 = arith.constant 0 : index
      %c256_76 = arith.constant 256 : index
      %112 = vector.load %arg11[%c2_74, %c0_75, %c256_76] : memref<4x2x512xbf16, #tpu.memory_space<vmem>>, vector<1x2x64xbf16>
      %113 = vector.shape_cast %112 : vector<1x2x64xbf16> to vector<2x64xbf16>
      %114 = vector.shape_cast %111 : vector<2x64xbf16> to vector<1x2x64xbf16>
      tpu.vector_store %arg11[%c2_74, %c0_75, %c256_76], %114 {strides = array<i32>} : memref<4x2x512xbf16, #tpu.memory_space<vmem>>, vector<1x2x64xbf16>,
      %115 = vector.extract_strided_slice %30 {offsets = [42, 0], sizes = [2, 64], strides = [1, 1]} : vector<64x64xbf16> to vector<2x64xbf16>
      %c2_77 = arith.constant 2 : index
      %c0_78 = arith.constant 0 : index
      %c320_79 = arith.constant 320 : index
      %116 = vector.load %arg11[%c2_77, %c0_78, %c320_79] : memref<4x2x512xbf16, #tpu.memory_space<vmem>>, vector<1x2x64xbf16>
      %117 = vector.shape_cast %116 : vector<1x2x64xbf16> to vector<2x64xbf16>
      %118 = vector.shape_cast %115 : vector<2x64xbf16> to vector<1x2x64xbf16>
      tpu.vector_store %arg11[%c2_77, %c0_78, %c320_79], %118 {strides = array<i32>} : memref<4x2x512xbf16, #tpu.memory_space<vmem>>, vector<1x2x64xbf16>,
      %119 = vector.extract_strided_slice %30 {offsets = [44, 0], sizes = [2, 64], strides = [1, 1]} : vector<64x64xbf16> to vector<2x64xbf16>
      %c2_80 = arith.constant 2 : index
      %c0_81 = arith.constant 0 : index
      %c384_82 = arith.constant 384 : index
      %120 = vector.load %arg11[%c2_80, %c0_81, %c384_82] : memref<4x2x512xbf16, #tpu.memory_space<vmem>>, vector<1x2x64xbf16>
      %121 = vector.shape_cast %120 : vector<1x2x64xbf16> to vector<2x64xbf16>
      %122 = vector.shape_cast %119 : vector<2x64xbf16> to vector<1x2x64xbf16>
      tpu.vector_store %arg11[%c2_80, %c0_81, %c384_82], %122 {strides = array<i32>} : memref<4x2x512xbf16, #tpu.memory_space<vmem>>, vector<1x2x64xbf16>,
      %123 = vector.extract_strided_slice %30 {offsets = [46, 0], sizes = [2, 64], strides = [1, 1]} : vector<64x64xbf16> to vector<2x64xbf16>
      %c2_83 = arith.constant 2 : index
      %c0_84 = arith.constant 0 : index
      %c448_85 = arith.constant 448 : index
      %124 = vector.load %arg11[%c2_83, %c0_84, %c448_85] : memref<4x2x512xbf16, #tpu.memory_space<vmem>>, vector<1x2x64xbf16>
      %125 = vector.shape_cast %124 : vector<1x2x64xbf16> to vector<2x64xbf16>
      %126 = vector.shape_cast %123 : vector<2x64xbf16> to vector<1x2x64xbf16>
      tpu.vector_store %arg11[%c2_83, %c0_84, %c448_85], %126 {strides = array<i32>} : memref<4x2x512xbf16, #tpu.memory_space<vmem>>, vector<1x2x64xbf16>,
      %127 = vector.extract_strided_slice %30 {offsets = [48, 0], sizes = [2, 64], strides = [1, 1]} : vector<64x64xbf16> to vector<2x64xbf16>
      %c3 = arith.constant 3 : index
      %c0_86 = arith.constant 0 : index
      %c0_87 = arith.constant 0 : index
      %128 = vector.load %arg11[%c3, %c0_86, %c0_87] : memref<4x2x512xbf16, #tpu.memory_space<vmem>>, vector<1x2x64xbf16>
      %129 = vector.shape_cast %128 : vector<1x2x64xbf16> to vector<2x64xbf16>
      %130 = vector.shape_cast %127 : vector<2x64xbf16> to vector<1x2x64xbf16>
      tpu.vector_store %arg11[%c3, %c0_86, %c0_87], %130 {strides = array<i32>} : memref<4x2x512xbf16, #tpu.memory_space<vmem>>, vector<1x2x64xbf16>,
      %131 = vector.extract_strided_slice %30 {offsets = [50, 0], sizes = [2, 64], strides = [1, 1]} : vector<64x64xbf16> to vector<2x64xbf16>
      %c3_88 = arith.constant 3 : index
      %c0_89 = arith.constant 0 : index
      %c64_90 = arith.constant 64 : index
      %132 = vector.load %arg11[%c3_88, %c0_89, %c64_90] : memref<4x2x512xbf16, #tpu.memory_space<vmem>>, vector<1x2x64xbf16>
      %133 = vector.shape_cast %132 : vector<1x2x64xbf16> to vector<2x64xbf16>
      %134 = vector.shape_cast %131 : vector<2x64xbf16> to vector<1x2x64xbf16>
      tpu.vector_store %arg11[%c3_88, %c0_89, %c64_90], %134 {strides = array<i32>} : memref<4x2x512xbf16, #tpu.memory_space<vmem>>, vector<1x2x64xbf16>,
      %135 = vector.extract_strided_slice %30 {offsets = [52, 0], sizes = [2, 64], strides = [1, 1]} : vector<64x64xbf16> to vector<2x64xbf16>
      %c3_91 = arith.constant 3 : index
      %c0_92 = arith.constant 0 : index
      %c128_93 = arith.constant 128 : index
      %136 = vector.load %arg11[%c3_91, %c0_92, %c128_93] : memref<4x2x512xbf16, #tpu.memory_space<vmem>>, vector<1x2x64xbf16>
      %137 = vector.shape_cast %136 : vector<1x2x64xbf16> to vector<2x64xbf16>
      %138 = vector.shape_cast %135 : vector<2x64xbf16> to vector<1x2x64xbf16>
      tpu.vector_store %arg11[%c3_91, %c0_92, %c128_93], %138 {strides = array<i32>} : memref<4x2x512xbf16, #tpu.memory_space<vmem>>, vector<1x2x64xbf16>,
      %139 = vector.extract_strided_slice %30 {offsets = [54, 0], sizes = [2, 64], strides = [1, 1]} : vector<64x64xbf16> to vector<2x64xbf16>
      %c3_94 = arith.constant 3 : index
      %c0_95 = arith.constant 0 : index
      %c192_96 = arith.constant 192 : index
      %140 = vector.load %arg11[%c3_94, %c0_95, %c192_96] : memref<4x2x512xbf16, #tpu.memory_space<vmem>>, vector<1x2x64xbf16>
      %141 = vector.shape_cast %140 : vector<1x2x64xbf16> to vector<2x64xbf16>
      %142 = vector.shape_cast %139 : vector<2x64xbf16> to vector<1x2x64xbf16>
      tpu.vector_store %arg11[%c3_94, %c0_95, %c192_96], %142 {strides = array<i32>} : memref<4x2x512xbf16, #tpu.memory_space<vmem>>, vector<1x2x64xbf16>,
      %143 = vector.extract_strided_slice %30 {offsets = [56, 0], sizes = [2, 64], strides = [1, 1]} : vector<64x64xbf16> to vector<2x64xbf16>
      %c3_97 = arith.constant 3 : index
      %c0_98 = arith.constant 0 : index
      %c256_99 = arith.constant 256 : index
      %144 = vector.load %arg11[%c3_97, %c0_98, %c256_99] : memref<4x2x512xbf16, #tpu.memory_space<vmem>>, vector<1x2x64xbf16>
      %145 = vector.shape_cast %144 : vector<1x2x64xbf16> to vector<2x64xbf16>
      %146 = vector.shape_cast %143 : vector<2x64xbf16> to vector<1x2x64xbf16>
      tpu.vector_store %arg11[%c3_97, %c0_98, %c256_99], %146 {strides = array<i32>} : memref<4x2x512xbf16, #tpu.memory_space<vmem>>, vector<1x2x64xbf16>,
      %147 = vector.extract_strided_slice %30 {offsets = [58, 0], sizes = [2, 64], strides = [1, 1]} : vector<64x64xbf16> to vector<2x64xbf16>
      %c3_100 = arith.constant 3 : index
      %c0_101 = arith.constant 0 : index
      %c320_102 = arith.constant 320 : index
      %148 = vector.load %arg11[%c3_100, %c0_101, %c320_102] : memref<4x2x512xbf16, #tpu.memory_space<vmem>>, vector<1x2x64xbf16>
      %149 = vector.shape_cast %148 : vector<1x2x64xbf16> to vector<2x64xbf16>
      %150 = vector.shape_cast %147 : vector<2x64xbf16> to vector<1x2x64xbf16>
      tpu.vector_store %arg11[%c3_100, %c0_101, %c320_102], %150 {strides = array<i32>} : memref<4x2x512xbf16, #tpu.memory_space<vmem>>, vector<1x2x64xbf16>,
      %151 = vector.extract_strided_slice %30 {offsets = [60, 0], sizes = [2, 64], strides = [1, 1]} : vector<64x64xbf16> to vector<2x64xbf16>
      %c3_103 = arith.constant 3 : index
      %c0_104 = arith.constant 0 : index
      %c384_105 = arith.constant 384 : index
      %152 = vector.load %arg11[%c3_103, %c0_104, %c384_105] : memref<4x2x512xbf16, #tpu.memory_space<vmem>>, vector<1x2x64xbf16>
      %153 = vector.shape_cast %152 : vector<1x2x64xbf16> to vector<2x64xbf16>
      %154 = vector.shape_cast %151 : vector<2x64xbf16> to vector<1x2x64xbf16>
      tpu.vector_store %arg11[%c3_103, %c0_104, %c384_105], %154 {strides = array<i32>} : memref<4x2x512xbf16, #tpu.memory_space<vmem>>, vector<1x2x64xbf16>,
      %155 = vector.extract_strided_slice %30 {offsets = [62, 0], sizes = [2, 64], strides = [1, 1]} : vector<64x64xbf16> to vector<2x64xbf16>
      %c3_106 = arith.constant 3 : index
      %c0_107 = arith.constant 0 : index
      %c448_108 = arith.constant 448 : index
      %156 = vector.load %arg11[%c3_106, %c0_107, %c448_108] : memref<4x2x512xbf16, #tpu.memory_space<vmem>>, vector<1x2x64xbf16>
      %157 = vector.shape_cast %156 : vector<1x2x64xbf16> to vector<2x64xbf16>
      %158 = vector.shape_cast %155 : vector<2x64xbf16> to vector<1x2x64xbf16>
      tpu.vector_store %arg11[%c3_106, %c0_107, %c448_108], %158 {strides = array<i32>} : memref<4x2x512xbf16, #tpu.memory_space<vmem>>, vector<1x2x64xbf16>,
      %cst_109 = arith.constant 0.000000e+00 : f32
      %159 = vector.broadcast %cst_109 : f32 to vector<2x512xf32>
      %c0_110 = arith.constant 0 : index
      %c0_111 = arith.constant 0 : index
      %160 = vector.load %arg12[%c0_110, %c0_111] : memref<2x512xf32, #tpu.memory_space<vmem>>, vector<2x512xf32>
      tpu.vector_store %arg12[%c0_110, %c0_111], %159 {strides = array<i32>} : memref<2x512xf32, #tpu.memory_space<vmem>>, vector<2x512xf32>,
    } else {
    }
    %c0 = arith.constant 0 : index
    %c0_1 = arith.constant 0 : index
    %3 = vector.load %arg12[%c0, %c0_1] : memref<2x512xf32, #tpu.memory_space<vmem>>, vector<2x512xf32>
    %4 = arith.index_cast %arg0 : i32 to index
    %c0_2 = arith.constant 0 : index
    %c0_3 = arith.constant 0 : index
    %5 = vector.load %arg11[%4, %c0_2, %c0_3] : memref<4x2x512xbf16, #tpu.memory_space<vmem>>, vector<1x2x512xbf16>
    %6 = vector.shape_cast %5 : vector<1x2x512xbf16> to vector<2x512xbf16>
    %c0_4 = arith.constant 0 : index
    %c0_5 = arith.constant 0 : index
    %7 = vector.load %arg6[%c0_4, %c0_5] : memref<512x512xbf16, #tpu.memory_space<vmem>>, vector<512x512xbf16>
    %cst = arith.constant dense<0.000000e+00> : vector<2x512xf32>
    %8 = tpu.matmul %6, %7, %cst {dimension_numbers = #tpu.dot_dimension_numbers<[1], [0], [0], [1], [0, 0, 1, 1], [], []>} : vector<2x512xbf16>, vector<512x512xbf16>, vector<2x512xf32> -> vector<2x512xf32>
    %9 = arith.addf %3, %8 : vector<2x512xf32>
    %c0_6 = arith.constant 0 : index
    %c0_7 = arith.constant 0 : index
    %10 = vector.load %arg12[%c0_6, %c0_7] : memref<2x512xf32, #tpu.memory_space<vmem>>, vector<2x512xf32>
    tpu.vector_store %arg12[%c0_6, %c0_7], %9 {strides = array<i32>} : memref<2x512xf32, #tpu.memory_space<vmem>>, vector<2x512xf32>,
    %c3_i32 = arith.constant 3 : i32
    %11 = arith.cmpi eq, %arg0, %c3_i32 : i32
    %12 = arith.extui %11 : i1 to i32
    %c0_i32_8 = arith.constant 0 : i32
    %13 = arith.cmpi ne, %12, %c0_i32_8 : i32
    scf.if %13 {
      %c0_9 = arith.constant 0 : index
      %c0_10 = arith.constant 0 : index
      %14 = vector.load %arg12[%c0_9, %c0_10] : memref<2x512xf32, #tpu.memory_space<vmem>>, vector<2x512xf32>
      %c0_11 = arith.constant 0 : index
      %c0_12 = arith.constant 0 : index
      %15 = vector.load %arg7[%c0_11, %c0_12] : memref<1x512xf32, #tpu.memory_space<vmem>>, vector<1x512xf32>
      %16 = vector.broadcast %15 : vector<1x512xf32> to vector<2x512xf32>
      %17 = arith.addf %14, %16 : vector<2x512xf32>
      %cst_13 = arith.constant 0.000000e+00 : f32
      %18 = vector.broadcast %cst_13 : f32 to vector<2x512xf32>
      %19 = arith.maximumf %17, %18 : vector<2x512xf32>
      %20 = arith.truncf %19 : vector<2x512xf32> to vector<2x512xbf16>
      %c0_14 = arith.constant 0 : index
      %c0_15 = arith.constant 0 : index
      %21 = vector.load %arg8[%c0_14, %c0_15] : memref<512x128xbf16, #tpu.memory_space<vmem>>, vector<512x128xbf16>
      %cst_16 = arith.constant dense<0.000000e+00> : vector<2x128xf32>
      %22 = tpu.matmul %20, %21, %cst_16 {dimension_numbers = #tpu.dot_dimension_numbers<[1], [0], [0], [1], [0, 0, 1, 1], [], []>} : vector<2x512xbf16>, vector<512x128xbf16>, vector<2x128xf32> -> vector<2x128xf32>
      %c0_17 = arith.constant 0 : index
      %c0_18 = arith.constant 0 : index
      %23 = vector.load %arg9[%c0_17, %c0_18] : memref<1x128xf32, #tpu.memory_space<vmem>>, vector<1x128xf32>
      %24 = vector.broadcast %23 : vector<1x128xf32> to vector<2x128xf32>
      %25 = arith.addf %22, %24 : vector<2x128xf32>
      %cst_19 = arith.constant dense<0xFF800000> : vector<2xf32>
      %26 = vector.multi_reduction <maximumf>, %25, %cst_19 [1] : vector<2x128xf32> to vector<2xf32>
      %27 = vector.shape_cast %26 : vector<2xf32> to vector<2x1xf32>
      %28 = vector.broadcast %27 : vector<2x1xf32> to vector<2x128xf32>
      %29 = arith.subf %25, %28 : vector<2x128xf32>
      %30 = math.exp %29 : vector<2x128xf32>
      %cst_20 = arith.constant dense<0.000000e+00> : vector<2xf32>
      %31 = vector.multi_reduction <add>, %30, %cst_20 [1] : vector<2x128xf32> to vector<2xf32>
      %32 = vector.shape_cast %31 : vector<2xf32> to vector<2x1xf32>
      %33 = vector.broadcast %32 : vector<2x1xf32> to vector<2x128xf32>
      %34 = arith.divf %30, %33 : vector<2x128xf32>
      %c0_21 = arith.constant 0 : index
      %c0_22 = arith.constant 0 : index
      %35 = vector.load %arg10[%c0_21, %c0_22] : memref<2x128xf32, #tpu.memory_space<vmem>>, vector<2x128xf32>
      tpu.vector_store %arg10[%c0_21, %c0_22], %34 {strides = array<i32>} : memref<2x128xf32, #tpu.memory_space<vmem>>, vector<2x128xf32>,
    } else {
    }
    return
  }
  func.func @transform_0(%arg0: i32) -> (i32, i32) {
    %c0_i32 = arith.constant 0 : i32
    %c0_i32_0 = arith.constant 0 : i32
    %c0_i32_1 = arith.constant 0 : i32
    return %c0_i32, %c0_i32_0 : i32, i32
  }
  func.func @transform_1(%arg0: i32) -> (i32, i32) {
    %c0_i32 = arith.constant 0 : i32
    %c0_i32_0 = arith.constant 0 : i32
    %c0_i32_1 = arith.constant 0 : i32
    return %c0_i32, %c0_i32_0 : i32, i32
  }
  func.func @transform_2(%arg0: i32) -> (i32, i32) {
    %c0_i32 = arith.constant 0 : i32
    %c0_i32_0 = arith.constant 0 : i32
    %c0_i32_1 = arith.constant 0 : i32
    return %c0_i32, %c0_i32_0 : i32, i32
  }
  func.func @transform_3(%arg0: i32) -> (i32, i32) {
    %c0_i32 = arith.constant 0 : i32
    %c0_i32_0 = arith.constant 0 : i32
    %c0_i32_1 = arith.constant 0 : i32
    return %c0_i32, %c0_i32_0 : i32, i32
  }
  func.func @transform_4(%arg0: i32) -> (i32, i32) {
    %c0_i32 = arith.constant 0 : i32
    %c0_i32_0 = arith.constant 0 : i32
    %c0_i32_1 = arith.constant 0 : i32
    return %c0_i32, %c0_i32_0 : i32, i32
  }
  func.func @transform_5(%arg0: i32) -> (i32, i32) {
    %c0_i32 = arith.constant 0 : i32
    %c0_i32_0 = arith.constant 0 : i32
    return %arg0, %c0_i32 : i32, i32
  }
  func.func @transform_6(%arg0: i32) -> (i32, i32) {
    %c0_i32 = arith.constant 0 : i32
    %c0_i32_0 = arith.constant 0 : i32
    %c0_i32_1 = arith.constant 0 : i32
    return %c0_i32, %c0_i32_0 : i32, i32
  }
  func.func @transform_7(%arg0: i32) -> (i32, i32) {
    %c0_i32 = arith.constant 0 : i32
    %c0_i32_0 = arith.constant 0 : i32
    %c0_i32_1 = arith.constant 0 : i32
    return %c0_i32, %c0_i32_0 : i32, i32
  }
  func.func @transform_8(%arg0: i32) -> (i32, i32) {
    %c0_i32 = arith.constant 0 : i32
    %c0_i32_0 = arith.constant 0 : i32
    %c0_i32_1 = arith.constant 0 : i32
    return %c0_i32, %c0_i32_0 : i32, i32
  }
  func.func @transform_9(%arg0: i32) -> (i32, i32) {
    %c0_i32 = arith.constant 0 : i32
    %c0_i32_0 = arith.constant 0 : i32
    %c0_i32_1 = arith.constant 0 : i32
    return %c0_i32, %c0_i32_0 : i32, i32
  }
}

</mosaic_0001>

<bundles_post_ra>
// kernel: tac_policy_forward.1
= control target key start
LH: loop header
LB: loop body
LE: loop exit
PB: predicated region body
PF: predicated region fallthrough
CT: control target
= control target key end

     0   :  { %s4134_s0 = inlined_call_operand.vmem [shape: bf16[64,16], index: 0, kind: input, shape index: {}]   ;;  %s4135_s1 = inlined_call_operand.hbm [shape: bf16[16,128], index: 1, kind: input, shape index: {}]   ;;  %s4136_s2 = inlined_call_operand.hbm [shape: f32[1,128], index: 2, kind: input, shape index: {}]   ;;  %s4137_s3 = inlined_call_operand.vmem [shape: bf16[128,64], index: 3, kind: input, shape index: {}]   ;;  %s4138_s4 = inlined_call_operand.hbm [shape: f32[1,64], index: 4, kind: input, shape index: {}]   ;;  %s4139_s5 = inlined_call_operand.hbm [shape: bf16[2048,512], index: 5, kind: input, shape index: {}]   ;;  %s4140_s6 = inlined_call_operand.hbm [shape: f32[1,512], index: 6, kind: input, shape index: {}]   ;;  %s4141_s7 = inlined_call_operand.hbm [shape: bf16[512,128], index: 7, kind: input, shape index: {}]   ;;  %s4142_s8 = inlined_call_operand.hbm [shape: f32[1,128], index: 8, kind: input, shape index: {}]   ;;  %s4143_s9 = inlined_call_operand.hbm [shape: f32[2,128], index: 9, kind: output, shape index: {}]  }
   0x1   :  { %4147 = sst [smem:[#allocation23_spill]] %s4136_s2 }
   0x2   :  { %4148 = sst [smem:[#allocation24_spill]] %s4140_s6 }
   0x3   :  { %4149 = sst [smem:[#allocation25_spill]] %s4143_s9 }
   0x4   :  { %14 = vsyncpa [#allocation5], 0 }
   0x5   :  { %15 = vsyncpa [#allocation8], 0 }
   0x6   :  { %16 = vsyncpa [#allocation11], 0 }
   0x7   :  { %18 = vsyncpa [#allocation11 + $0x1], 0 }
   0x8   :  { %19 = vsyncpa [#allocation14], 0 }
   0x9   :  { %20 = vsyncpa [#allocation6], 0  ;;  %s3574_s30 = smov 0   ;;  %s3576_s10 = smov 0  }
   0xa   :  { %s3578_s11 = smov 0   ;;  %s3580_s12 = smov 0  }
   0xb LB: > { %s3507_s13 = smov [#allocation7]   ;;  %s3595_s15 = sadd.s32 4294967295, %s3505_s12   ;;  %s3505_s12 = sphi %s3580_s12, %s4172_s12   ;;  %s3501_s11 = sphi %s3578_s11, %s4171_s11   ;;  %s3497_s10 = sphi %s3576_s10, %s4170_s10   ;;  %s3493_s30 = sphi %s3574_s30, %s4169_s30  }
   0xc   : > { %s275_s14 = sshll.u32 %s3507_s13, 4  ;;  %p2537_p0 = scmp.ge.s32.totalorder %s3505_s12, 1  ;;  %s276_s14 = int_to_ptr.vmem [resolvable:$true] %s275_s14 }
   0xd   : > { %p4144_p1 = scmp.eq.s32.totalorder %s3595_s15, 0  ;;  %p246_p2 = scmp.lt.s32.totalorder %s3505_s12, 5 }
   0xe   : > { %s3508_s17 = smov [#allocation12]   ;;  %s3509_s20 = smov [#allocation13]  }
   0xf   : > { %p3601_p4 = pnand %p2537_p0, %p246_p2  ;;  %s300_s18 = sshll.u32 %s3508_s17, 4  ;;  %s3607_s18 = int_to_ptr.vmem [resolvable:$true] %s300_s18 }
  0x10   : > { %s310_s21 = sshll.u32 %s3509_s20, 4  ;;  %s4152_s2 = sld [smem:[#allocation23_spill]]  ;;  %s3615_s21 = int_to_ptr.vmem [resolvable:$true] %s310_s21 }
  0x11   : > { %s4150_s16 = scalar_select %p3601_p4, 1, 0 }
  0x12   : > { %p2900_p5 = pneg %p3601_p4 }
  0x14   : > { %p3611_p6 = pnand %p2900_p5, %p4144_p1 }
  0x16   : > { %s3227_s24 = scalar_lea.hbm %s4152_s2, 16  ;;  %p3625_p8 = pneg %p3611_p6 }
  0x17   : > { %p3228_p7 = scmp.ne.s32.totalorder %s4152_s2, %s3227_s24  ;;  %p3234_p11 = scmp.lt.u32.totalorder %s3227_s24, %s4152_s2 }
  0x19   : > { %p3230_p9 = pnand %p3625_p8, %p3228_p7 }
  0x1b   : > { %p3231_p10 = pneg %p3230_p9 }
  0x1d   : > { %p3236_p12 = pnand %p3234_p11, %p3231_p10 }
  0x1f   : > { %3239 = shalt.err (!%p3236_p12)
}
  0x20   : > { %s3240_s13 = scalar_lea.vmem %s276_s14, 16  ;;  %s3247_s17 = scalar_lea.vmem %s276_s14, 32 }
  0x21   : > { %p3241_p13 = scmp.ne.s32.totalorder %s276_s14, %s3240_s13  ;;  %p3248_p5 = scmp.lt.s32.totalorder %s276_s14, %s276_s14 }
  0x22   : > { %p3249_p3 = scmp.lt.s32.totalorder %s3247_s17, %s3240_s13 }
  0x23   : > { %p3243_p0 = pnand %p3241_p13, %p3625_p8 }
  0x24   : > { %p3250_p1 = por %p3249_p3, %p3248_p5 }
  0x25   : > { %p3244_p2 = pneg %p3243_p0 }
  0x27   : > { %p3251_p4 = pnand %p3250_p1, %p3244_p2 }
  0x29   : > { %3254 = shalt.err (!%p3251_p4)
}
  0x2a   : > { %2906 = dma.hbm_to_vmem [thread:$0]  (!%p3611_p6), %s4152_s2, 16, %s276_s14, [#allocation8]  }
  0x2b   : > { %s4154_s6 = sld [smem:[#allocation24_spill]] }
  0x31   : > { %s3255_s25 = scalar_lea.hbm %s4154_s6, 64 }
  0x32   : > { %p3256_p7 = scmp.ne.s32.totalorder %s4154_s6, %s3255_s25  ;;  %p3262_p1 = scmp.lt.u32.totalorder %s3255_s25, %s4154_s6 }
  0x34   : > { %p3258_p9 = pnand %p3256_p7, %p3625_p8 }
  0x36   : > { %p3259_p3 = pneg %p3258_p9 }
  0x38   : > { %p3264_p4 = pnand %p3262_p1, %p3259_p3 }
  0x3a   : > { %3267 = shalt.err (!%p3264_p4)
}
  0x3b   : > { %s3268_s14 = scalar_lea.vmem %s3607_s18, 64  ;;  %p3276_p13 = scmp.lt.s32.totalorder %s3607_s18, %s3607_s18 }
  0x3c   : > { %p3269_p10 = scmp.ne.s32.totalorder %s3607_s18, %s3268_s14  ;;  %p3277_p0 = scmp.lt.s32.totalorder %s3268_s14, %s3268_s14 }
  0x3e   : > { %p3271_p11 = pnand %p3269_p10, %p3625_p8  ;;  %p3278_p2 = por %p3277_p0, %p3276_p13 }
  0x40   : > { %p3272_p12 = pneg %p3271_p11 }
  0x42   : > { %p3279_p5 = pnand %p3278_p2, %p3272_p12 }
  0x44   : > { %3282 = shalt.err (!%p3279_p5)
}
  0x45   : > { %2912 = dma.hbm_to_vmem [thread:$0]  (!%p3611_p6), %s4154_s6, 64, %s3607_s18, [#allocation11]  }
  0x46   : > { %s3283_s24 = scalar_lea.hbm %s4141_s7, 4096 }
  0x47   : > { %p3284_p7 = scmp.ne.s32.totalorder %s4141_s7, %s3283_s24  ;;  %p3290_p1 = scmp.lt.u32.totalorder %s3283_s24, %s4141_s7 }
  0x49   : > { %p3286_p9 = pnand %p3284_p7, %p3625_p8 }
  0x4b   : > { %p3287_p3 = pneg %p3286_p9 }
  0x4d   : > { %p3292_p4 = pnand %p3290_p1, %p3287_p3 }
  0x4f   : > { %3295 = shalt.err (!%p3292_p4)
}
  0x50   : > { %s3296_s18 = scalar_lea.vmem %s3615_s21, 4096  ;;  %p3304_p13 = scmp.lt.s32.totalorder %s3615_s21, %s3615_s21 }
  0x51   : > { %p3297_p10 = scmp.ne.s32.totalorder %s3615_s21, %s3296_s18  ;;  %p3305_p0 = scmp.lt.s32.totalorder %s3296_s18, %s3296_s18 }
  0x53   : > { %p3299_p11 = pnand %p3297_p10, %p3625_p8  ;;  %p3306_p2 = por %p3305_p0, %p3304_p13 }
  0x55   : > { %p3300_p12 = pneg %p3299_p11 }
  0x57   : > { %p3307_p5 = pnand %p3306_p2, %p3300_p12 }
  0x59   : > { %3310 = shalt.err (!%p3307_p5)
}
  0x5a   : > { %s3510_s13 = smov 64   ;;  %s3511_s14 = smov 4  }
  0x5b   : > { %2915 = dma.hbm_to_vmem [thread:$0]  (!%p3611_p6), %s4141_s7, 4096, %s3615_s21, [#allocation14], %s3510_s13, %s3510_s13, %s3511_s14  }
  0x5c   : > { %s3512_s22 = smov [#allocation4]   ;;  %s3513_s24 = smov [#allocation9]  }
  0x5d   : > { %s261_s23 = sshll.u32 %s3512_s22, 4  ;;  %s289_s25 = sshll.u32 %s3513_s24, 4  ;;  %s262_s23 = int_to_ptr.vmem [resolvable:$true] %s261_s23  ;;  %s290_s25 = int_to_ptr.vmem [resolvable:$true] %s289_s25 }
  0x5e   : > { %s3311_s29 = scalar_lea.hbm %s4135_s1, 128 }
  0x5f   : > { %p3312_p7 = scmp.ne.s32.totalorder %s4135_s1, %s3311_s29  ;;  %p3318_p1 = scmp.lt.u32.totalorder %s3311_s29, %s4135_s1 }
  0x61   : > { %p3314_p9 = pnand %p3312_p7, %p3625_p8 }
  0x63   : > { %p3315_p3 = pneg %p3314_p9 }
  0x65   : > { %p3320_p4 = pnand %p3318_p1, %p3315_p3 }
  0x67   : > { %3323 = shalt.err (!%p3320_p4)
}
  0x68   : > { %s3324_s21 = scalar_lea.vmem %s262_s23, 128  ;;  %p3332_p13 = scmp.lt.s32.totalorder %s262_s23, %s262_s23 }
  0x69   : > { %p3325_p10 = scmp.ne.s32.totalorder %s262_s23, %s3324_s21  ;;  %p3333_p0 = scmp.lt.s32.totalorder %s3324_s21, %s3324_s21 }
  0x6b   : > { %p3327_p11 = pnand %p3325_p10, %p3625_p8  ;;  %p3334_p2 = por %p3333_p0, %p3332_p13 }
  0x6d   : > { %p3328_p12 = pneg %p3327_p11 }
  0x6f   : > { %p3335_p5 = pnand %p3334_p2, %p3328_p12 }
  0x71   : > { %3338 = shalt.err (!%p3335_p5)
}
  0x72   : > { %2903 = dma.hbm_to_vmem [thread:$0]  (!%p3611_p6), %s4135_s1, 128, %s262_s23, [#allocation5], %s3510_s13, %s3510_s13, %s3511_s14  }
  0x73   : > { %s3339_s20 = scalar_lea.hbm %s4138_s4, 16 }
  0x74   : > { %p3340_p7 = scmp.ne.s32.totalorder %s4138_s4, %s3339_s20  ;;  %p3346_p1 = scmp.lt.u32.totalorder %s3339_s20, %s4138_s4 }
  0x76   : > { %p3342_p9 = pnand %p3340_p7, %p3625_p8 }
  0x78   : > { %p3343_p3 = pneg %p3342_p9 }
  0x7a   : > { %p3348_p4 = pnand %p3346_p1, %p3343_p3 }
  0x7c   : > { %3351 = shalt.err (!%p3348_p4)
}
  0x7d   : > { %s3352_s29 = scalar_lea.vmem %s290_s25, 16  ;;  %s3359_s13 = scalar_lea.vmem %s290_s25, 32 }
  0x7e   : > { %p3353_p10 = scmp.ne.s32.totalorder %s290_s25, %s3352_s29  ;;  %p3360_p13 = scmp.lt.s32.totalorder %s290_s25, %s290_s25 }
  0x7f   : > { %p3361_p0 = scmp.lt.s32.totalorder %s3359_s13, %s3352_s29 }
  0x80   : > { %p3355_p11 = pnand %p3353_p10, %p3625_p8 }
  0x81   : > { %p3362_p2 = por %p3361_p0, %p3360_p13 }
  0x82   : > { %p3356_p12 = pneg %p3355_p11 }
  0x84   : > { %p3363_p5 = pnand %p3362_p2, %p3356_p12 }
  0x86   : > { %3366 = shalt.err (!%p3363_p5)
}
  0x87   : > { %2909 = dma.hbm_to_vmem [thread:$0]  (!%p3611_p6), %s4138_s4, 16, %s290_s25, [#allocation8]  }
  0x88   : > { %s3514_s18 = smov [#allocation15]   ;;  %s3367_s6 = scalar_lea.hbm %s4142_s8, 16 }
  0x89   : > { %s324_s21 = sshll.u32 %s3514_s18, 4  ;;  %p3368_p7 = scmp.ne.s32.totalorder %s4142_s8, %s3367_s6  ;;  %s325_s21 = int_to_ptr.vmem [resolvable:$true] %s324_s21 }
  0x8a   : > { %p3374_p1 = scmp.lt.u32.totalorder %s3367_s6, %s4142_s8 }
  0x8b   : > { %p3370_p9 = pnand %p3368_p7, %p3625_p8 }
  0x8d   : > { %p3371_p3 = pneg %p3370_p9 }
  0x8f   : > { %p3376_p4 = pnand %p3374_p1, %p3371_p3 }
  0x91   : > { %3379 = shalt.err (!%p3376_p4)
}
  0x92   : > { %s3380_s25 = scalar_lea.vmem %s325_s21, 16  ;;  %s3387_s26 = scalar_lea.vmem %s325_s21, 32 }
  0x93   : > { %p3381_p10 = scmp.ne.s32.totalorder %s325_s21, %s3380_s25  ;;  %p3388_p13 = scmp.lt.s32.totalorder %s325_s21, %s325_s21 }
  0x94   : > { %p3389_p0 = scmp.lt.s32.totalorder %s3387_s26, %s3380_s25 }
  0x95   : > { %p3383_p11 = pnand %p3381_p10, %p3625_p8 }
  0x96   : > { %p3390_p2 = por %p3389_p0, %p3388_p13 }
  0x97   : > { %p3384_p12 = pneg %p3383_p11 }
  0x99   : > { %p3391_p5 = pnand %p3390_p2, %p3384_p12 }
  0x9b   : > { %3394 = shalt.err (!%p3391_p5)
}
  0x9c   : > { %2918 = dma.hbm_to_vmem [thread:$0]  (!%p3611_p6), %s4142_s8, 16, %s325_s21, [#allocation14]  }
  0x9d   : > { %s3742_s27 = sadd.s32 1, %s3505_s12   ;;  %s138_s19 = sadd.s32 1, %s3501_s11 }
  0x9e   : > { %s135_s13 = ssub.s32 %s3505_s12, %s3742_s27  ;;  %p145_p8 = scmp.ne.s32.totalorder %s3501_s11, %s3497_s10 }
  0x9f   : > { %p136_p7 = scmp.eq.s32.totalorder %s135_s13, 0  ;;  %p146_p9 = scmp.eq.s32.totalorder %s3505_s12, 0 }
  0xa0   : > { %p151_p3 = scmp.ne.s32.totalorder %s3497_s10, %s3493_s30  ;;  %p2929_p1 = scmp.lt.s32.totalorder %s3505_s12, 4 }
  0xa1   : > { %s3754_s14 = scalar_select %p136_p7, %s3501_s11, %s138_s19  }
  0xa2   : > { %p147_p4 = por %p146_p9, %p145_p8  ;;  %p4155_p10 = scmp.eq.s32.totalorder %s3595_s15, 0 }
  0xa3   : > { %s335_s18 = sand.u32 1, %s3505_s12   ;;  %s337_s21 = sand.u32 1, %s3501_s11  }
  0xa4   : > { %p3758_p11 = por %p4155_p10, %p151_p3  ;;  %s2545_s2 = sshll.u32 %s337_s21, 10 }
  0xa5   : > { %s2750_s17 = sshll.u32 %s3505_s12, 14  ;;  %s339_s30 = scalar_lea.vmem [#allocation10], %s2545_s2 }
  0xa6   : > { %s3768_s20 = scalar_lea.hbm %s4139_s5, %s2750_s17  ;;  %s347_s22 = sshll.u32 %s339_s30, 4  ;;  %s3770_s22 = int_to_ptr.vmem [resolvable:$true] %s347_s22 }
  0xa7   : > { %p3772_p6 = pnand %p2929_p1, %p147_p4  ;;  %s3776_s12 = scalar_lea.sflag [#allocation11], %s335_s18 }
  0xa8   : > { %s3395_s25 = scalar_lea.hbm %s3768_s20, 16384  ;;  %s3400_s29 = scalar_lea.hbm %s4139_s5, 65536 }
  0xa9   : > { %p3396_p12 = scmp.ne.s32.totalorder %s3768_s20, %s3395_s25  ;;  %p3397_p13 = pneg %p3772_p6 }
  0xaa   : > { %p3401_p5 = scmp.lt.u32.totalorder %s3768_s20, %s4139_s5  ;;  %p3402_p8 = scmp.lt.u32.totalorder %s3400_s29, %s3395_s25 }
  0xab   : > { %p3398_p0 = pnand %p3397_p13, %p3396_p12  ;;  %p3404_p9 = scmp.lt.u32.totalorder %s3395_s25, %s3768_s20 }
  0xac   : > { %p3403_p7 = por %p3402_p8, %p3401_p5 }
  0xad   : > { %p3399_p2 = pneg %p3398_p0 }
  0xae   : > { %p3405_p3 = por %p3404_p9, %p3403_p7 }
  0xb0   : > { %p3406_p1 = pnand %p3405_p3, %p3399_p2 }
  0xb2   : > { %3409 = shalt.err (!%p3406_p1)
}
  0xb3   : > { %s3410_s18 = scalar_lea.vmem %s3770_s22, 16384  ;;  %s3515_s21 = smov [#allocation10]  }
  0xb4   : > { %p3411_p4 = scmp.ne.s32.totalorder %s3770_s22, %s3410_s18  ;;  %s3415_s2 = sshll.u32 %s3515_s21, 4  ;;  %s3416_s2 = int_to_ptr.vmem [resolvable:$false] %s3415_s2 }
  0xb5   : > { %s3417_s17 = scalar_lea.vmem %s3416_s2, 32768  ;;  %p3418_p0 = scmp.lt.s32.totalorder %s3770_s22, %s3416_s2 }
  0xb6   : > { %p3413_p10 = pnand %p3411_p4, %p3397_p13  ;;  %p3419_p5 = scmp.lt.s32.totalorder %s3417_s17, %s3410_s18 }
  0xb8   : > { %p3414_p12 = pneg %p3413_p10  ;;  %p3420_p8 = por %p3419_p5, %p3418_p0 }
  0xba   : > { %p3421_p7 = pnand %p3420_p8, %p3414_p12 }
  0xbc   : > { %3424 = shalt.err (!%p3421_p7)
}
  0xbd   : > { %s3516_s6 = smov 256   ;;  %s3517_s9 = smov 16  }
  0xbe   : > { %2922 = dma.hbm_to_vmem [thread:$0]  (!%p3772_p6), %s3768_s20, 16384, %s3770_s22, %s3776_s12, %s3516_s6, %s3516_s6, %s3517_s9  }
  0xbf   : > { %p4158_p13 = scmp.ne.s32.totalorder %s4150_s16, 0 }
  0xc0   : > { %p4159_p2 = scmp.eq.s32.totalorder (!%p4158_p13), %s3595_s15, 0 }
  0xc1   : > { %359 = sbr.rel (%p4158_p13) target bundleno = 1747 (0x6d3), region = 56 }
  0xc8   : > { %3468 = dma.done.wait (%p4159_p2), [#allocation5], 128   ;;  %p4160_p9 = pmov %p4159_p2 }
  0xc9   : > { %p4161_p3 = pmov %p4159_p2 }
  0xca   : > { %3470 = vsyncadd (%p4160_p9), [#allocation5], 4294967168 }
  0xcb   : > { %3472 = dma.done.wait (%p4161_p3), [#allocation8], 32   ;;  %p4162_p1 = pmov %p4159_p2 }
  0xcc   : > { %s373_s30 = sand.u32 1, %s3595_s15   ;;  %s375_s20 = sand.u32 1, %s3497_s10  }
  0xcd   : > { %3474 = vsyncadd (%p4162_p1), [#allocation8], 4294967264  ;;  %s2553_s22 = sshll.u32 %s375_s20, 10  ;;  %s374_s16 = scalar_lea.sflag [#allocation11], %s373_s30 }
  0xce   : > { %s3816_s24 = scalar_lea.vmem [#allocation10], %s2553_s22 }
  0xcf   : > { %3476 = dma.done.wait (%p3758_p11), %s374_s16, 16384  }
  0xd0   : > { %3478 = vsyncadd (%p3758_p11), %s374_s16, 4294950912  ;;  %p4163_p6 = pmov %p4162_p1 }
  0xd1   : > { %p4164_p4 = pmov %p4162_p1 }
  0xd2   : > { %3480 = dma.done.wait (%p4163_p6), [#allocation11], 64  }
  0xd3   : > { %3482 = vsyncadd (%p4164_p4), [#allocation11], 4294967232  ;;  %p4165_p10 = pmov %p4162_p1 }
  0xd4   : > { %p4166_p12 = pmov %p4162_p1 }
  0xd5   : > { %3484 = dma.done.wait (%p4165_p10), [#allocation14], 4112  }
  0xd6   : > { %3486 = vsyncadd (%p4166_p12), [#allocation14], 4294963184  ;;  %p4167_p0 = scmp.ne.s32.totalorder %s3595_s15, 0 }
  0xd7   : > { %v2986_v0 = vld [vmem:[#allocation4] sm:$0xff] (!%p4167_p0)   ;;  %vm468_vm0 = vcmask (!%p4167_p0), 130048   ;;  %v2987_v1 = vld [vmem:[%s4134_s0] sm:$0xff] (!%p4167_p0)   ;;  %v2988_v2 = vld [vmem:[%s4134_s0 + $0x8] sm:$0xff] (!%p4167_p0)   ;;  %v3518_v42 = vmov (!%p4167_p0), 1966171168   ;;  %v712_v44 = vlaneseq (!%p4167_p0) }
  0xd8   : > { %424 = sbr.rel (%p4167_p0) target bundleno = 813 (0x32d), region = 88  ;;  %2812 = vmatprep.subr.bf16.mxu0 (!%p4167_p0), %v2986_v0  ;;  %2814 = vmatprep.mubr.msk.bf16.mxu0 (!%p4167_p0), %vm468_vm0, %v2987_v1  ;;  %v2989_v3 = vld [vmem:[%s4134_s0 + $0x10] sm:$0xff] (!%p4167_p0)   ;;  %v2991_v4 = vld [vmem:[%s4137_s3] sm:$0xff] (!%p4167_p0)   ;;  %v2992_v5 = vld [vmem:[%s4137_s3 + $0x8] sm:$0xff] (!%p4167_p0)   ;;  %v710_v43 = vunpack.c.l.s4 (!%p4167_p0), %v3518_v42  ;;  %vm706_vm1 = vcmask (!%p4167_p0), 516096   ;;  %s3519_s19 = smov (!%p4167_p0), 64  }
  0xd9   : > { %2813 = vmatpush3.bf16.msra.mxu0 (!%p4167_p0), %v2986_v0  ;;  %2846 = vmatprep.subr.bf16.mxu1 (!%p4167_p0), %v2991_v4  ;;  %v2993_v6 = vld [vmem:[%s4137_s3 + $0x10] sm:$0xff] (!%p4167_p0)   ;;  %v2990_v7 = vld [vmem:[%s4134_s0 + $0x18] sm:$0xff] (!%p4167_p0)   ;;  %v2995_v9 = vld [vmem:[%s4137_s3 + $0x20] sm:$0xff] (!%p4167_p0)   ;;  %v713_v50 = vshrl.u32 (!%p4167_p0), %v712_v44, 7  ;;  %vm734_vm2 = vcmask (!%p4167_p0), 1040896  }
  0xda   : > { %2822 = vmatprep.subr.bf16.mxu0 (!%p4167_p0), %v2991_v4  ;;  %2854 = vmatpush3.bf16.msra.mxu1 (!%p4167_p0), %v2991_v4  ;;  %v2994_v8 = vld [vmem:[%s4137_s3 + $0x18] sm:$0xff] (!%p4167_p0)   ;;  %v2996_v10 = vld [vmem:[%s4137_s3 + $0x28] sm:$0xff] (!%p4167_p0)   ;;  %v2997_v11 = vld [vmem:[%s4137_s3 + $0x30] sm:$0xff] (!%p4167_p0)   ;;  %v711_v49 = vunpack.c.0.s8 (!%p4167_p0), %v710_v43 }
  0xdb   : > { %2847 = vmatprep.subr.bf16.mxu1 (!%p4167_p0), %v2992_v5  ;;  %v2998_v12 = vld [vmem:[%s4137_s3 + $0x38] sm:$0xff] (!%p4167_p0)   ;;  %v2558_v13 = vld [vmem:[#allocation7] ss:$0 sm:$0xff] (!%p4167_p0)  ;;  %v2568_v45 = vld [vmem:[#allocation9] ss:$0 sm:$0xff] (!%p4167_p0) }
  0xdc   : > { %2815 = vmatmul.mubr.msk.bf16.vlgmr.msra.gmra.mrb[0].mxu0 (!%p4167_p0), %vm468_vm0, %v2988_v2  ;;  %v3872_v58 = vsub.s32 (!%p4167_p0), %v711_v49, %v713_v50 }
  0xdd   : > { %2818 = vmatprep.mubr.msk.bf16.mxu0 (!%p4167_p0), %vm468_vm0, %v2989_v3  ;;  %2823 = vmatpush3.bf16.msra.mxu0 (!%p4167_p0), %v2991_v4 }
  0xde   : > { %2824 = vmatprep.subr.bf16.mxu0 (!%p4167_p0), %v2992_v5  ;;  %2855 = vmatpush3.bf16.msra.mxu1 (!%p4167_p0), %v2992_v5 }
  0xdf   : > { %2848 = vmatprep.subr.bf16.mxu1 %v2993_v6 }
  0xe1   : > { %2825 = vmatpush3.bf16.msra.mxu0 %v2992_v5 }
  0xe2   : > { %2826 = vmatprep.subr.bf16.mxu0 %v2993_v6  ;;  %2856 = vmatpush3.bf16.msra.mxu1 %v2993_v6 }
  0xe3   : > { %2849 = vmatprep.subr.bf16.mxu1 %v2994_v8 }
  0xe4   : > { %2819 = vmatmul.mubr.msk.bf16.gmra.mrb[4].mxu0 %vm468_vm0, %v2990_v7 }
  0xe5   : > { %2827 = vmatpush3.bf16.msra.mxu0 %v2993_v6 }
  0xe6   : > { %2828 = vmatprep.subr.bf16.mxu0 %v2994_v8  ;;  %2857 = vmatpush3.bf16.msra.mxu1 %v2994_v8 }
  0xe7   : > { %2850 = vmatprep.subr.bf16.mxu1 %v2995_v9 }
  0xe9   : > { %2829 = vmatpush3.bf16.msra.mxu0 %v2994_v8 }
  0xea   : > { %2830 = vmatprep.subr.bf16.mxu0 %v2995_v9  ;;  %2858 = vmatpush3.bf16.msra.mxu1 %v2995_v9 }
  0xeb   : > { %2851 = vmatprep.subr.bf16.mxu1 %v2996_v10 }
  0xed   : > { %2831 = vmatpush3.bf16.msra.mxu0 %v2995_v9 }
  0xee   : > { %2832 = vmatprep.subr.bf16.mxu0 %v2996_v10  ;;  %2859 = vmatpush3.bf16.msra.mxu1 %v2996_v10 }
  0xef   : > { %2852 = vmatprep.subr.bf16.mxu1 %v2997_v11 }
  0xf1   : > { %2833 = vmatpush3.bf16.msra.mxu0 %v2996_v10 }
  0xf2   : > { %2834 = vmatprep.subr.bf16.mxu0 %v2997_v11  ;;  %2860 = vmatpush3.bf16.msra.mxu1 %v2997_v11 }
  0xf3   : > { %2853 = vmatprep.subr.bf16.mxu1 %v2998_v12 }
  0xf5   : > { %2835 = vmatpush3.bf16.msra.mxu0 %v2997_v11 }
  0xf6   : > { %2836 = vmatprep.subr.bf16.mxu0 %v2998_v12  ;;  %2861 = vmatpush3.bf16.msra.mxu1 %v2998_v12 }
  0xf9   : > { %2837 = vmatpush3.bf16.msra.mxu0 %v2998_v12 }
 0x1af   : > { %v2816_v14 = vpop.f32.mrb[0].mxu0 }
 0x1b0   : > { %v524_v15 = vadd.f32 %v2816_v14, %v2558_v13  ;;  %v515_v16 = vpop.f32.mrb[1].mxu0 }
 0x1b1   : > { %v516_v17 = vadd.f32 %v2558_v13, %v515_v16  ;;  %v2817_v18 = vpop.f32.mrb[2].mxu0 }
 0x1b2   : > { %v527_v19 = vadd.f32 %v2817_v18, %v2558_v13  ;;  %v518_v20 = vpop.f32.mrb[3].mxu0  ;;  %v548_v22 = vmax.f32 %v524_v15, 0.0 }
 0x1b3   : > { %v519_v21 = vadd.f32 %v2558_v13, %v518_v20  ;;  %v546_v24 = vmax.f32 %v516_v17, 0.0 }
 0x1b4   : > { %v549_v23 = vmax.f32 %v527_v19, 0.0 }
 0x1b5   : > { %v547_v25 = vmax.f32 %v519_v21, 0.0 }
 0x1b6   : > { %v555_v26 = vpack.c.bf16 %v549_v23, %v548_v22 }
 0x1b7   : > { %v554_v27 = vpack.c.bf16 %v547_v25, %v546_v24  ;;  %v2820_v28 = vpop.f32.mrb[4].mxu0 }
 0x1b8   : > { %v540_v29 = vadd.f32 %v2820_v28, %v2558_v13  ;;  %v531_v30 = vpop.f32.mrb[5].mxu0 }
 0x1b9   : > { %v532_v31 = vadd.f32 %v2558_v13, %v531_v30  ;;  %v2821_v32 = vpop.f32.mrb[6].mxu0  ;;  %2838 = vmatprep.mubr.bf16.mxu0 %v554_v27 }
 0x1ba   : > { %v552_v33 = vmax.f32 %v540_v29, 0.0  ;;  %v543_v34 = vadd.f32 %v2821_v32, %v2558_v13  ;;  %v534_v35 = vpop.f32.mrb[7].mxu0  ;;  %2839 = vmatmul.mubr.bf16.vlgmr.msra.gmra.mrb[8].mxu0 %v555_v26 }
 0x1bb   : > { %v550_v36 = vmax.f32 %v532_v31, 0.0  ;;  %v535_v37 = vadd.f32 %v2558_v13, %v534_v35 }
 0x1bc   : > { %v553_v38 = vmax.f32 %v543_v34, 0.0 }
 0x1bd   : > { %v551_v39 = vmax.f32 %v535_v37, 0.0 }
 0x1be   : > { %v557_v40 = vpack.c.bf16 %v553_v38, %v552_v33 }
 0x1bf   : > { %v556_v41 = vpack.c.bf16 %v551_v39, %v550_v36 }
 0x1c1   : > { %2842 = vmatprep.mubr.bf16.mxu1 %v556_v41 }
 0x1c2   : > { %2843 = vmatmul.mubr.bf16.vlgmr.msra.gmra.mrb[0].mxu1 %v557_v40 }
 0x28d   : > { %v2840_v46 = vpop.f32.mrb[8].mxu0 }
 0x28e   : > { %v672_v47 = vadd.f32 %v2840_v46, %v2568_v45  ;;  %v663_v48 = vpop.f32.mrb[9].mxu0 }
 0x28f   : > { %v664_v51 = vadd.f32 %v2568_v45, %v663_v48  ;;  %v2841_v52 = vpop.f32.mrb[10].mxu0 }
 0x290   : > { %v675_v53 = vadd.f32 %v2841_v52, %v2568_v45  ;;  %v666_v54 = vpop.f32.mrb[11].mxu0  ;;  %v696_v56 = vmax.f32 %v672_v47, 0.0 }
 0x291   : > { %v667_v55 = vadd.f32 %v2568_v45, %v666_v54  ;;  %v694_v59 = vmax.f32 %v664_v51, 0.0 }
 0x292   : > { %v697_v57 = vmax.f32 %v675_v53, 0.0 }
 0x293   : > { %v695_v60 = vmax.f32 %v667_v55, 0.0 }
 0x294   : > { %v703_v61 = vpack.c.bf16 %v697_v57, %v696_v56  ;;  %v2578_v62 = vpack.c.bf16 %v697_v57, %v697_v57 }
 0x295   : > { %v702_v63 = vpack.c.bf16 %v695_v60, %v694_v59  ;;  %v2577_v0 = vpack.c.bf16 %v695_v60, %v695_v60  ;;  %v2844_v1 = vpop.f32.mrb[0].mxu1  ;;  %v3520_v60 = vmov 0.0  }
 0x296   : > { %v790_v2 = vrot.slane %v703_v61, %v3872_v58  ;;  %v825_v3 = vrot.slane %v2578_v62, %v3872_v58  ;;  %v688_v4 = vadd.f32 %v2844_v1, %v2568_v45  ;;  %v679_v5 = vpop.f32.mrb[1].mxu1  ;;  %782 = vst.msk [vmem:[#allocation2 + $0x4] sm:$0x1] %vm706_vm1, %v703_v61  ;;  %1003 = vst [vmem:[#allocation3] sm:$0xff] %v3520_v60 }
 0x297   : > { %v751_v6 = vrot.slane %v2577_v0, %v3872_v58  ;;  %v680_v7 = vadd.f32 %v2568_v45, %v679_v5  ;;  %v2845_v8 = vpop.f32.mrb[2].mxu1  ;;  %707 = vst.msk [vmem:[#allocation2] sm:$0x1] %vm706_vm1, %v702_v63  ;;  %v715_v9 = vrot.slane %v702_v63, %v3872_v58 }
 0x298   : > { %v700_v10 = vmax.f32 %v688_v4, 0.0  ;;  %v691_v11 = vadd.f32 %v2845_v8, %v2568_v45  ;;  %v682_v12 = vpop.f32.mrb[3].mxu1  ;;  %v791_v13 = vcombine.high %v790_v2, %v790_v2  ;;  %v835_v17 = vcombine.high %v825_v3, %v825_v3 }
 0x299   : > { %v698_v14 = vmax.f32 %v680_v7, 0.0  ;;  %v683_v15 = vadd.f32 %v2568_v45, %v682_v12  ;;  %v761_v16 = vcombine.high %v751_v6, %v751_v6  ;;  %v758_v20 = vrot.slane %v751_v6, %v3872_v58 }
 0x29a   : > { %v701_v18 = vmax.f32 %v691_v11, 0.0  ;;  %v805_v19 = vrot.slane %v791_v13, %v3872_v58  ;;  %v832_v23 = vrot.slane %v825_v3, %v3872_v58  ;;  %v716_v26 = vcombine.high %v715_v9, %v715_v9 }
 0x29b   : > { %v699_v21 = vmax.f32 %v683_v15, 0.0  ;;  %v768_v22 = vrot.slane %v761_v16, %v3872_v58  ;;  %760 = vst.msk [vmem:[#allocation2 + $0x2] sm:$0x1] %vm706_vm1, %v758_v20  ;;  %v842_v30 = vrot.slane %v835_v17, %v3872_v58  ;;  %v798_v33 = vrot.slane %v790_v2, %v3872_v58 }
 0x29c   : > { %v705_v24 = vpack.c.bf16 %v701_v18, %v700_v10  ;;  %v2580_v25 = vpack.c.bf16 %v701_v18, %v701_v18  ;;  %806 = vrot.lane.b32.xlu0 %v805_v19, %s3519_s19  ;;  %v813_v29 = vcombine.high %v805_v19, %v805_v19  ;;  %834 = vst.msk [vmem:[#allocation2 + $0x6] sm:$0x1] %vm706_vm1, %v832_v23 }
 0x29d   : > { %v704_v27 = vpack.c.bf16 %v699_v21, %v698_v14  ;;  %v2579_v28 = vpack.c.bf16 %v699_v21, %v699_v21  ;;  %769 = vrot.lane.b32.xlu1 %v768_v22, %s3519_s19  ;;  %v847_v34 = vcombine.high %v832_v23, %v832_v23  ;;  %v723_v37 = vrot.slane %v715_v9, %v3872_v58 }
 0x29e   : > { %v938_v31 = vrot.slane %v705_v24, %v3872_v58  ;;  %v973_v32 = vrot.slane %v2580_v25, %v3872_v58  ;;  %930 = vst.msk [vmem:[#allocation2 + $0xc] sm:$0x1] %vm706_vm1, %v705_v24  ;;  %v773_v38 = vcombine.high %v758_v20, %v758_v20  ;;  %v810_v39 = vcombine.high %v798_v33, %v798_v33 }
 0x29f   : > { %v864_v35 = vrot.slane %v704_v27, %v3872_v58  ;;  %v899_v36 = vrot.slane %v2579_v28, %v3872_v58  ;;  %856 = vst.msk [vmem:[#allocation2 + $0x8] sm:$0x1] %vm706_vm1, %v704_v27  ;;  %849 = vst.msk [vmem:[#allocation2 + $0x7] sm:$0x1] %vm706_vm1, %v847_v34  ;;  %v736_v41 = vcombine.high %v723_v37, %v723_v37 }
 0x2a0   : > { %843 = vrot.lane.b32.xlu0 %v842_v30, %s3519_s19  ;;  %v946_v40 = vrot.slane %v938_v31, %v3872_v58  ;;  %775 = vst.msk [vmem:[#allocation2 + $0x3] sm:$0x1] %vm706_vm1, %v773_v38  ;;  %v730_v43 = vrot.slane %v716_v26, %v3872_v58  ;;  %812 = vst.msk [vmem:[#allocation2 + $0x5] sm:$0x1] %vm706_vm1, %v810_v39  ;;  %v850_v46 = vcombine.high %v842_v30, %v842_v30 }
 0x2a1   : > { %814 = vrot.lane.b32.xlu1 %v813_v29, %s3519_s19  ;;  %v872_v42 = vrot.slane %v864_v35, %v3872_v58  ;;  %v906_v45 = vrot.slane %v899_v36, %v3872_v58  ;;  %v939_v47 = vcombine.high %v938_v31, %v938_v31  ;;  %738 = vst.msk [vmem:[#allocation2 + $0x1] sm:$0x1] %vm706_vm1, %v736_v41 }
 0x2a2   : > { %v958_v44 = vcombine.high %v946_v40, %v946_v40  ;;  %v980_v49 = vrot.slane %v973_v32, %v3872_v58  ;;  %v739_v52 = vcombine.high %v730_v43, %v730_v43  ;;  %v776_v53 = vcombine.high %v768_v22, %v768_v22 }
 0x2a3   : > { %v884_v48 = vcombine.high %v872_v42, %v872_v42  ;;  %908 = vst.msk [vmem:[#allocation2 + $0xa] sm:$0x1] %vm706_vm1, %v906_v45  ;;  %v921_v50 = vcombine.high %v906_v45, %v906_v45  ;;  %v953_v54 = vrot.slane %v939_v47, %v3872_v58  ;;  %v865_v55 = vcombine.high %v864_v35, %v864_v35 }
 0x2a4   : > { %731 = vrot.lane.b32.xlu0 %v730_v43, %s3519_s19  ;;  %960 = vst.msk [vmem:[#allocation2 + $0xd] sm:$0x1] %vm706_vm1, %v958_v44  ;;  %982 = vst.msk [vmem:[#allocation2 + $0xe] sm:$0x1] %vm706_vm1, %v980_v49  ;;  %v995_v51 = vcombine.high %v980_v49, %v980_v49  ;;  %v909_v59 = vcombine.high %v899_v36, %v899_v36  ;;  %v983_v63 = vcombine.high %v973_v32, %v973_v32 }
 0x2a5   : > { %851 = vrot.lane.b32.xlu1 %v850_v46, %s3519_s19  ;;  %886 = vst.msk [vmem:[#allocation2 + $0x9] sm:$0x1] %vm706_vm1, %v884_v48  ;;  %923 = vst.msk [vmem:[#allocation2 + $0xb] sm:$0x1] %vm706_vm1, %v921_v50  ;;  %v961_v56 = vcombine.high %v953_v54, %v953_v54  ;;  %v879_v57 = vrot.slane %v865_v55, %v3872_v58 }
 0x2a6   : > { %997 = vst.msk [vmem:[#allocation2 + $0xf] sm:$0x1] %vm706_vm1, %v995_v51  ;;  %v916_v62 = vrot.slane %v909_v59, %v3872_v58  ;;  %v990_v1 = vrot.slane %v983_v63, %v3872_v58 }
 0x2a7   : > { %v887_v61 = vcombine.high %v879_v57, %v879_v57 }
 0x2a8   : > { %740 = vrot.lane.b32.xlu0 %v739_v52, %s3519_s19  ;;  %v924_v0 = vcombine.high %v916_v62, %v916_v62  ;;  %v998_v2 = vcombine.high %v990_v1, %v990_v1 }
 0x2a9   : > { %777 = vrot.lane.b32.xlu1 %v776_v53, %s3519_s19 }
 0x2ac   : > { %954 = vrot.lane.b32.xlu0 %v953_v54, %s3519_s19 }
 0x2ad   : > { %962 = vrot.lane.b32.xlu1 %v961_v56, %s3519_s19 }
 0x2b0   : > { %880 = vrot.lane.b32.xlu0 %v879_v57, %s3519_s19 }
 0x2b1   : > { %888 = vrot.lane.b32.xlu1 %v887_v61, %s3519_s19 }
 0x2b4   : > { %917 = vrot.lane.b32.xlu0 %v916_v62, %s3519_s19 }
 0x2b5   : > { %925 = vrot.lane.b32.xlu1 %v924_v0, %s3519_s19 }
 0x2b8   : > { %991 = vrot.lane.b32.xlu0 %v990_v1, %s3519_s19 }
 0x2b9   : > { %999 = vrot.lane.b32.xlu1 %v998_v2, %s3519_s19 }
 0x30e   : > { %v807_v3 = vpop.permute.xlu0 %806 }
 0x30f   : > { %809 = vst.msk [vmem:[#allocation2 + $0x4] sm:$0x1] %vm734_vm2, %v807_v3  ;;  %v770_v4 = vpop.permute.xlu1 %769 }
 0x310   : > { %772 = vst.msk [vmem:[#allocation2 + $0x2] sm:$0x1] %vm734_vm2, %v770_v4 }
 0x312   : > { %v844_v5 = vpop.permute.xlu0 %843 }
 0x313   : > { %846 = vst.msk [vmem:[#allocation2 + $0x6] sm:$0x1] %vm734_vm2, %v844_v5  ;;  %v815_v58 = vpop.permute.xlu1 %814 }
 0x314   : > { %817 = vst.msk [vmem:[#allocation2 + $0x5] sm:$0x1] %vm734_vm2, %v815_v58 }
 0x316   : > { %v732_v6 = vpop.permute.xlu0 %731 }
 0x317   : > { %735 = vst.msk [vmem:[#allocation2] sm:$0x1] %vm734_vm2, %v732_v6  ;;  %v852_v7 = vpop.permute.xlu1 %851 }
 0x318   : > { %854 = vst.msk [vmem:[#allocation2 + $0x7] sm:$0x1] %vm734_vm2, %v852_v7 }
 0x31a   : > { %v741_v8 = vpop.permute.xlu0 %740 }
 0x31b   : > { %743 = vst.msk [vmem:[#allocation2 + $0x1] sm:$0x1] %vm734_vm2, %v741_v8  ;;  %v778_v9 = vpop.permute.xlu1 %777 }
 0x31c   : > { %780 = vst.msk [vmem:[#allocation2 + $0x3] sm:$0x1] %vm734_vm2, %v778_v9 }
 0x31e   : > { %v955_v10 = vpop.permute.xlu0 %954 }
 0x31f   : > { %957 = vst.msk [vmem:[#allocation2 + $0xc] sm:$0x1] %vm734_vm2, %v955_v10  ;;  %v963_v11 = vpop.permute.xlu1 %962 }
 0x320   : > { %965 = vst.msk [vmem:[#allocation2 + $0xd] sm:$0x1] %vm734_vm2, %v963_v11 }
 0x322   : > { %v881_v12 = vpop.permute.xlu0 %880 }
 0x323   : > { %883 = vst.msk [vmem:[#allocation2 + $0x8] sm:$0x1] %vm734_vm2, %v881_v12  ;;  %v889_v13 = vpop.permute.xlu1 %888 }
 0x324   : > { %891 = vst.msk [vmem:[#allocation2 + $0x9] sm:$0x1] %vm734_vm2, %v889_v13 }
 0x326   : > { %v918_v14 = vpop.permute.xlu0 %917 }
 0x327   : > { %920 = vst.msk [vmem:[#allocation2 + $0xa] sm:$0x1] %vm734_vm2, %v918_v14  ;;  %v926_v15 = vpop.permute.xlu1 %925 }
 0x328   : > { %928 = vst.msk [vmem:[#allocation2 + $0xb] sm:$0x1] %vm734_vm2, %v926_v15 }
 0x32a   : > { %v992_v16 = vpop.permute.xlu0 %991 }
 0x32b   : > { %994 = vst.msk [vmem:[#allocation2 + $0xe] sm:$0x1] %vm734_vm2, %v992_v16  ;;  %v1000_v17 = vpop.permute.xlu1 %999 }
 0x32c   : > { %1002 = vst.msk [vmem:[#allocation2 + $0xf] sm:$0x1] %vm734_vm2, %v1000_v17 }
 0x32d PF: > { %v2999_v18 = vld [vmem:[%s3816_s24 + $0x4] ss:$16 sps:$4 sm:$0xff]   ;;  %v3001_v19 = vld [vmem:[%s3816_s24 + $0xc] ss:$16 sps:$4 sm:$0xff]   ;;  %v3003_v20 = vld [vmem:[%s3816_s24] ss:$16 sps:$4 sm:$0xff]   ;;  %v1148_v59 = vlaneseq }
 0x32e   : > { %1805 = vmatprep.subr.bf16.mxu0 %v2999_v18  ;;  %v3004_v21 = vld [vmem:[%s3816_s24 + $0x8] ss:$16 sps:$4 sm:$0xff]   ;;  %1887 = vmatprep.subr.bf16.mxu1 %v3001_v19  ;;  %v3005_v22 = vld [vmem:[%s3816_s24 + $0x24] ss:$16 sps:$4 sm:$0xff]   ;;  %v3007_v23 = vld [vmem:[%s3816_s24 + $0x2c] ss:$16 sps:$4 sm:$0xff]  }
 0x32f   : > { %1806 = vmatpush1.bf16.msra.mxu0 %v3003_v20  ;;  %1888 = vmatpush1.bf16.msra.mxu1 %v3004_v21  ;;  %v3009_v24 = vld [vmem:[%s3816_s24 + $0x20] ss:$16 sps:$4 sm:$0xff]   ;;  %v3010_v25 = vld [vmem:[%s3816_s24 + $0x28] ss:$16 sps:$4 sm:$0xff]   ;;  %v3011_v26 = vld [vmem:[%s3816_s24 + $0x44] ss:$16 sps:$4 sm:$0xff]  }
 0x330   : > { %1807 = vmatprep.subr.bf16.mxu0 %v3005_v22  ;;  %1889 = vmatprep.subr.bf16.mxu1 %v3007_v23  ;;  %v3013_v27 = vld [vmem:[%s3816_s24 + $0x4c] ss:$16 sps:$4 sm:$0xff]   ;;  %v3015_v28 = vld [vmem:[%s3816_s24 + $0x40] ss:$16 sps:$4 sm:$0xff]   ;;  %v3016_v29 = vld [vmem:[%s3816_s24 + $0x48] ss:$16 sps:$4 sm:$0xff]  }
 0x331   : > { %v3017_v30 = vld [vmem:[%s3816_s24 + $0x64] ss:$16 sps:$4 sm:$0xff]   ;;  %v3019_v31 = vld [vmem:[%s3816_s24 + $0x6c] ss:$16 sps:$4 sm:$0xff]   ;;  %v3021_v32 = vld [vmem:[%s3816_s24 + $0x60] ss:$16 sps:$4 sm:$0xff]  }
 0x332   : > { %v3022_v33 = vld [vmem:[%s3816_s24 + $0x68] ss:$16 sps:$4 sm:$0xff]   ;;  %v3023_v34 = vld [vmem:[%s3816_s24 + $0x84] ss:$16 sps:$4 sm:$0xff]   ;;  %v3025_v35 = vld [vmem:[%s3816_s24 + $0x8c] ss:$16 sps:$4 sm:$0xff]  }
 0x333   : > { %1808 = vmatpush1.bf16.msra.mxu0 %v3009_v24  ;;  %1890 = vmatpush1.bf16.msra.mxu1 %v3010_v25  ;;  %v3027_v36 = vld [vmem:[%s3816_s24 + $0x80] ss:$16 sps:$4 sm:$0xff]   ;;  %v3028_v37 = vld [vmem:[%s3816_s24 + $0x88] ss:$16 sps:$4 sm:$0xff]   ;;  %v3029_v38 = vld [vmem:[%s3816_s24 + $0xa4] ss:$16 sps:$4 sm:$0xff]  }
 0x334   : > { %1809 = vmatprep.subr.bf16.mxu0 %v3011_v26  ;;  %1891 = vmatprep.subr.bf16.mxu1 %v3013_v27  ;;  %v3031_v39 = vld [vmem:[%s3816_s24 + $0xac] ss:$16 sps:$4 sm:$0xff]   ;;  %v3033_v40 = vld [vmem:[%s3816_s24 + $0xa0] ss:$16 sps:$4 sm:$0xff]   ;;  %v3034_v41 = vld [vmem:[%s3816_s24 + $0xa8] ss:$16 sps:$4 sm:$0xff]  }
 0x335   : > { %v3035_v42 = vld [vmem:[%s3816_s24 + $0xc4] ss:$16 sps:$4 sm:$0xff]   ;;  %v3037_v43 = vld [vmem:[%s3816_s24 + $0xcc] ss:$16 sps:$4 sm:$0xff]   ;;  %v3039_v44 = vld [vmem:[%s3816_s24 + $0xc0] ss:$16 sps:$4 sm:$0xff]  }
 0x336   : > { %v3040_v45 = vld [vmem:[%s3816_s24 + $0xc8] ss:$16 sps:$4 sm:$0xff]   ;;  %v3041_v46 = vld [vmem:[%s3816_s24 + $0xe4] ss:$16 sps:$4 sm:$0xff]   ;;  %v3043_v47 = vld [vmem:[%s3816_s24 + $0xec] ss:$16 sps:$4 sm:$0xff]  }
 0x337   : > { %1810 = vmatpush1.bf16.msra.mxu0 %v3015_v28  ;;  %1892 = vmatpush1.bf16.msra.mxu1 %v3016_v29  ;;  %v3045_v48 = vld [vmem:[%s3816_s24 + $0xe0] ss:$16 sps:$4 sm:$0xff]   ;;  %v3046_v49 = vld [vmem:[%s3816_s24 + $0xe8] ss:$16 sps:$4 sm:$0xff]   ;;  %v3047_v50 = vld [vmem:[%s3816_s24 + $0x104] ss:$16 sps:$4 sm:$0xff]  }
 0x338   : > { %1811 = vmatprep.subr.bf16.mxu0 %v3017_v30  ;;  %1893 = vmatprep.subr.bf16.mxu1 %v3019_v31  ;;  %v3049_v51 = vld [vmem:[%s3816_s24 + $0x10c] ss:$16 sps:$4 sm:$0xff]   ;;  %v3051_v52 = vld [vmem:[%s3816_s24 + $0x100] ss:$16 sps:$4 sm:$0xff]   ;;  %v3052_v53 = vld [vmem:[%s3816_s24 + $0x108] ss:$16 sps:$4 sm:$0xff]  }
 0x339   : > { %v3053_v54 = vld [vmem:[%s3816_s24 + $0x124] ss:$16 sps:$4 sm:$0xff]   ;;  %v3055_v55 = vld [vmem:[%s3816_s24 + $0x12c] ss:$16 sps:$4 sm:$0xff]   ;;  %v3521_v56 = vmov 1966171168  }
 0x33a   : > { %v1146_v57 = vunpack.c.l.s4 %v3521_v56  ;;  %v3057_v60 = vld [vmem:[%s3816_s24 + $0x120] ss:$16 sps:$4 sm:$0xff]   ;;  %v3058_v61 = vld [vmem:[%s3816_s24 + $0x128] ss:$16 sps:$4 sm:$0xff]   ;;  %v3059_v62 = vld [vmem:[%s3816_s24 + $0x144] ss:$16 sps:$4 sm:$0xff]  }
 0x33b   : > { %1812 = vmatpush1.bf16.msra.mxu0 %v3021_v32  ;;  %1894 = vmatpush1.bf16.msra.mxu1 %v3022_v33  ;;  %v3061_v63 = vld [vmem:[%s3816_s24 + $0x14c] ss:$16 sps:$4 sm:$0xff]   ;;  %s2581_s13 = sshll.u32 %s3595_s15, 2  ;;  %v3989_v1 = vshrl.u32 %v1148_v59, 7  ;;  %v3063_v2 = vld [vmem:[%s3816_s24 + $0x140] ss:$16 sps:$4 sm:$0xff]  }
 0x33c   : > { %1813 = vmatprep.subr.bf16.mxu0 %v3023_v34  ;;  %1895 = vmatprep.subr.bf16.mxu1 %v3025_v35  ;;  %v1147_v0 = vunpack.c.0.s8 %v1146_v57  ;;  %v3064_v3 = vld [vmem:[%s3816_s24 + $0x148] ss:$16 sps:$4 sm:$0xff]   ;;  %v3065_v4 = vld [vmem:[%s3816_s24 + $0x164] ss:$16 sps:$4 sm:$0xff]   ;;  %v3067_v5 = vld [vmem:[%s3816_s24 + $0x16c] ss:$16 sps:$4 sm:$0xff]  }
 0x33d   : > { %s1006_s18 = scalar_lea.vmem [#allocation2], %s2581_s13  ;;  %v3069_v7 = vld [vmem:[%s3816_s24 + $0x160] ss:$16 sps:$4 sm:$0xff]   ;;  %v3070_v8 = vld [vmem:[%s3816_s24 + $0x168] ss:$16 sps:$4 sm:$0xff]   ;;  %p2711_p11 = scmp.ne.s32.totalorder %s3595_s15, 3 }
 0x33e   : > { %v1150_v58 = vsub.s32 %v1147_v0, %v3989_v1  ;;  %v2582_v6 = vld.sshfl [vmem:[%s1006_s18] sm:$0x33 pattern:$0x75316420]  ;;  %v3071_v10 = vld [vmem:[%s3816_s24 + $0x184] ss:$16 sps:$4 sm:$0xff]  }
 0x33f   : > { %1814 = vmatpush1.bf16.msra.mxu0 %v3027_v36  ;;  %1896 = vmatpush1.bf16.msra.mxu1 %v3028_v37  ;;  %v1144_v9 = vcombine.high %v2582_v6, %v2582_v6  ;;  %v3073_v11 = vld [vmem:[%s3816_s24 + $0x18c] ss:$16 sps:$4 sm:$0xff]   ;;  %v3075_v13 = vld [vmem:[%s3816_s24 + $0x180] ss:$16 sps:$4 sm:$0xff]   ;;  %v3076_v14 = vld [vmem:[%s3816_s24 + $0x188] ss:$16 sps:$4 sm:$0xff]  }
 0x340   : > { %1815 = vmatprep.subr.bf16.mxu0 %v3029_v38  ;;  %1897 = vmatprep.subr.bf16.mxu1 %v3031_v39  ;;  %v3077_v15 = vld [vmem:[%s3816_s24 + $0x1a4] ss:$16 sps:$4 sm:$0xff]   ;;  %v3079_v16 = vld [vmem:[%s3816_s24 + $0x1ac] ss:$16 sps:$4 sm:$0xff]   ;;  %v3081_v17 = vld [vmem:[%s3816_s24 + $0x1a0] ss:$16 sps:$4 sm:$0xff]   ;;  %v4017_v30 = vrot.slane %v2582_v6, %v1150_v58 }
 0x341   : > { %v1158_v12 = vrot.slane %v1144_v9, %v1150_v58  ;;  %v3082_v18 = vld [vmem:[%s3816_s24 + $0x1a8] ss:$16 sps:$4 sm:$0xff]   ;;  %v3083_v19 = vld [vmem:[%s3816_s24 + $0x1c4] ss:$16 sps:$4 sm:$0xff]   ;;  %v3085_v20 = vld [vmem:[%s3816_s24 + $0x1cc] ss:$16 sps:$4 sm:$0xff]  }
 0x342   : > { %v3087_v21 = vld [vmem:[%s3816_s24 + $0x1c0] ss:$16 sps:$4 sm:$0xff]   ;;  %v3088_v22 = vld [vmem:[%s3816_s24 + $0x1c8] ss:$16 sps:$4 sm:$0xff]   ;;  %v3089_v23 = vld [vmem:[%s3816_s24 + $0x1e4] ss:$16 sps:$4 sm:$0xff]  }
 0x343   : > { %1816 = vmatpush1.bf16.msra.mxu0 %v3033_v40  ;;  %1898 = vmatpush1.bf16.msra.mxu1 %v3034_v41  ;;  %v3091_v24 = vld [vmem:[%s3816_s24 + $0x1ec] ss:$16 sps:$4 sm:$0xff]   ;;  %v3093_v25 = vld [vmem:[%s3816_s24 + $0x1e0] ss:$16 sps:$4 sm:$0xff]   ;;  %v3094_v26 = vld [vmem:[%s3816_s24 + $0x1e8] ss:$16 sps:$4 sm:$0xff]   ;;  %v1160_v34 = vcombine.high %v1158_v12, %v1158_v12 }
 0x344   : > { %1817 = vmatprep.subr.bf16.mxu0 %v3035_v42  ;;  %1899 = vmatprep.subr.bf16.mxu1 %v3037_v43  ;;  %v3097_v27 = vld [vmem:[%s3816_s24 + $0x204] ss:$16 sps:$4 sm:$0xff]   ;;  %v3100_v28 = vld [vmem:[%s3816_s24 + $0x20c] ss:$16 sps:$4 sm:$0xff]   ;;  %v3095_v29 = vld [vmem:[%s3816_s24 + $0x200] ss:$16 sps:$4 sm:$0xff]  }
 0x345   : > { %1837 = vmatprep.mubr.bf16.mxu0 %v1158_v12  ;;  %1919 = vmatprep.mubr.bf16.mxu1 %v1158_v12  ;;  %v3098_v31 = vld [vmem:[%s3816_s24 + $0x208] ss:$16 sps:$4 sm:$0xff]   ;;  %v3103_v32 = vld [vmem:[%s3816_s24 + $0x224] ss:$16 sps:$4 sm:$0xff]   ;;  %v3106_v33 = vld [vmem:[%s3816_s24 + $0x22c] ss:$16 sps:$4 sm:$0xff]  }
 0x346   : > { %v3101_v35 = vld [vmem:[%s3816_s24 + $0x220] ss:$16 sps:$4 sm:$0xff]   ;;  %v3104_v36 = vld [vmem:[%s3816_s24 + $0x228] ss:$16 sps:$4 sm:$0xff]   ;;  %v3109_v37 = vld [vmem:[%s3816_s24 + $0x244] ss:$16 sps:$4 sm:$0xff]  }
 0x347   : > { %1818 = vmatpush1.bf16.msra.mxu0 %v3039_v44  ;;  %1900 = vmatpush1.bf16.msra.mxu1 %v3040_v45  ;;  %v3112_v38 = vld [vmem:[%s3816_s24 + $0x24c] ss:$16 sps:$4 sm:$0xff]   ;;  %v3107_v39 = vld [vmem:[%s3816_s24 + $0x240] ss:$16 sps:$4 sm:$0xff]   ;;  %v3110_v40 = vld [vmem:[%s3816_s24 + $0x248] ss:$16 sps:$4 sm:$0xff]  }
 0x348   : > { %1819 = vmatprep.subr.bf16.mxu0 %v3041_v46  ;;  %1901 = vmatprep.subr.bf16.mxu1 %v3043_v47  ;;  %v3115_v41 = vld [vmem:[%s3816_s24 + $0x264] ss:$16 sps:$4 sm:$0xff]   ;;  %v3118_v42 = vld [vmem:[%s3816_s24 + $0x26c] ss:$16 sps:$4 sm:$0xff]   ;;  %v3113_v43 = vld [vmem:[%s3816_s24 + $0x260] ss:$16 sps:$4 sm:$0xff]  }
 0x349   : > { %v3116_v44 = vld [vmem:[%s3816_s24 + $0x268] ss:$16 sps:$4 sm:$0xff]   ;;  %v3121_v45 = vld [vmem:[%s3816_s24 + $0x284] ss:$16 sps:$4 sm:$0xff]   ;;  %v3124_v46 = vld [vmem:[%s3816_s24 + $0x28c] ss:$16 sps:$4 sm:$0xff]  }
 0x34a   : > { %v3119_v47 = vld [vmem:[%s3816_s24 + $0x280] ss:$16 sps:$4 sm:$0xff]   ;;  %v3134_v56 = vld [vmem:[%s3816_s24 + $0x2c8] ss:$16 sps:$4 sm:$0xff]   ;;  %v3139_v57 = vld [vmem:[%s3816_s24 + $0x2e4] ss:$16 sps:$4 sm:$0xff]  }
 0x34b   : > { %1820 = vmatpush1.bf16.msra.mxu0 %v3045_v48  ;;  %1902 = vmatpush1.bf16.msra.mxu1 %v3046_v49  ;;  %v3122_v48 = vld [vmem:[%s3816_s24 + $0x288] ss:$16 sps:$4 sm:$0xff]   ;;  %v3127_v49 = vld [vmem:[%s3816_s24 + $0x2a4] ss:$16 sps:$4 sm:$0xff]   ;;  %v3142_v59 = vld [vmem:[%s3816_s24 + $0x2ec] ss:$16 sps:$4 sm:$0xff]  }
 0x34c   : > { %1821 = vmatprep.subr.bf16.mxu0 %v3047_v50  ;;  %1903 = vmatprep.subr.bf16.mxu1 %v3049_v51  ;;  %v3130_v50 = vld [vmem:[%s3816_s24 + $0x2ac] ss:$16 sps:$4 sm:$0xff]   ;;  %v3125_v51 = vld [vmem:[%s3816_s24 + $0x2a0] ss:$16 sps:$4 sm:$0xff]   ;;  %v3152_v58 = vld [vmem:[%s3816_s24 + $0x328] ss:$16 sps:$4 sm:$0xff]  }
 0x34d   : > { %v3143_v0 = vld [vmem:[%s3816_s24 + $0x300] ss:$16 sps:$4 sm:$0xff]   ;;  %v3157_v6 = vld [vmem:[%s3816_s24 + $0x344] ss:$16 sps:$4 sm:$0xff]   ;;  %v3158_v9 = vld [vmem:[%s3816_s24 + $0x348] ss:$16 sps:$4 sm:$0xff]  }
 0x34e   : > { %v3161_v12 = vld [vmem:[%s3816_s24 + $0x360] ss:$16 sps:$4 sm:$0xff]   ;;  %vm2405_vm3 = vcmask (!%p2711_p11), 1041408  }
 0x34f   : > { %1822 = vmatpush1.bf16.msra.mxu0 %v3051_v52  ;;  %1904 = vmatpush1.bf16.msra.mxu1 %v3052_v53  ;;  %v3128_v52 = vld [vmem:[%s3816_s24 + $0x2a8] ss:$16 sps:$4 sm:$0xff]   ;;  %v3133_v53 = vld [vmem:[%s3816_s24 + $0x2c4] ss:$16 sps:$4 sm:$0xff]  }
 0x350   : > { %1823 = vmatprep.subr.bf16.mxu0 %v3053_v54  ;;  %1905 = vmatprep.subr.bf16.mxu1 %v3055_v55  ;;  %v3136_v54 = vld [vmem:[%s3816_s24 + $0x2cc] ss:$16 sps:$4 sm:$0xff]   ;;  %v3131_v55 = vld [vmem:[%s3816_s24 + $0x2c0] ss:$16 sps:$4 sm:$0xff]  }
 0x353   : > { %1824 = vmatpush1.bf16.msra.mxu0 %v3057_v60  ;;  %1906 = vmatpush1.bf16.msra.mxu1 %v3058_v61  ;;  %v3137_v60 = vld [vmem:[%s3816_s24 + $0x2e0] ss:$16 sps:$4 sm:$0xff]   ;;  %v3140_v61 = vld [vmem:[%s3816_s24 + $0x2e8] ss:$16 sps:$4 sm:$0xff]  }
 0x354   : > { %1825 = vmatprep.subr.bf16.mxu0 %v3059_v62  ;;  %1907 = vmatprep.subr.bf16.mxu1 %v3061_v63  ;;  %v3145_v62 = vld [vmem:[%s3816_s24 + $0x304] ss:$16 sps:$4 sm:$0xff]   ;;  %v3148_v63 = vld [vmem:[%s3816_s24 + $0x30c] ss:$16 sps:$4 sm:$0xff]  }
 0x357   : > { %1826 = vmatpush1.bf16.msra.mxu0 %v3063_v2  ;;  %1908 = vmatpush1.bf16.msra.mxu1 %v3064_v3  ;;  %v3146_v2 = vld [vmem:[%s3816_s24 + $0x308] ss:$16 sps:$4 sm:$0xff]   ;;  %v3151_v3 = vld [vmem:[%s3816_s24 + $0x324] ss:$16 sps:$4 sm:$0xff]  }
 0x358   : > { %1827 = vmatprep.subr.bf16.mxu0 %v3065_v4  ;;  %1909 = vmatprep.subr.bf16.mxu1 %v3067_v5  ;;  %v3154_v4 = vld [vmem:[%s3816_s24 + $0x32c] ss:$16 sps:$4 sm:$0xff]   ;;  %v3149_v5 = vld [vmem:[%s3816_s24 + $0x320] ss:$16 sps:$4 sm:$0xff]  }
 0x35b   : > { %1828 = vmatpush1.bf16.msra.mxu0 %v3069_v7  ;;  %1910 = vmatpush1.bf16.msra.mxu1 %v3070_v8  ;;  %v3160_v7 = vld [vmem:[%s3816_s24 + $0x34c] ss:$16 sps:$4 sm:$0xff]   ;;  %v3155_v8 = vld [vmem:[%s3816_s24 + $0x340] ss:$16 sps:$4 sm:$0xff]  }
 0x35c   : > { %1829 = vmatprep.subr.bf16.mxu0 %v3071_v10  ;;  %1911 = vmatprep.subr.bf16.mxu1 %v3073_v11  ;;  %v3163_v10 = vld [vmem:[%s3816_s24 + $0x364] ss:$16 sps:$4 sm:$0xff]   ;;  %v3166_v11 = vld [vmem:[%s3816_s24 + $0x36c] ss:$16 sps:$4 sm:$0xff]  }
 0x35f   : > { %1830 = vmatpush1.bf16.msra.mxu0 %v3075_v13  ;;  %1912 = vmatpush1.bf16.msra.mxu1 %v3076_v14  ;;  %v3164_v13 = vld [vmem:[%s3816_s24 + $0x368] ss:$16 sps:$4 sm:$0xff]   ;;  %v3169_v14 = vld [vmem:[%s3816_s24 + $0x384] ss:$16 sps:$4 sm:$0xff]  }
 0x360   : > { %1831 = vmatprep.subr.bf16.mxu0 %v3077_v15  ;;  %1913 = vmatprep.subr.bf16.mxu1 %v3079_v16  ;;  %v3172_v15 = vld [vmem:[%s3816_s24 + $0x38c] ss:$16 sps:$4 sm:$0xff]   ;;  %v3167_v16 = vld [vmem:[%s3816_s24 + $0x380] ss:$16 sps:$4 sm:$0xff]  }
 0x363   : > { %1832 = vmatpush1.bf16.msra.mxu0 %v3081_v17  ;;  %1914 = vmatpush1.bf16.msra.mxu1 %v3082_v18  ;;  %v3170_v17 = vld [vmem:[%s3816_s24 + $0x388] ss:$16 sps:$4 sm:$0xff]   ;;  %v3175_v18 = vld [vmem:[%s3816_s24 + $0x3a4] ss:$16 sps:$4 sm:$0xff]  }
 0x364   : > { %1833 = vmatprep.subr.bf16.mxu0 %v3083_v19  ;;  %1915 = vmatprep.subr.bf16.mxu1 %v3085_v20  ;;  %v3178_v19 = vld [vmem:[%s3816_s24 + $0x3ac] ss:$16 sps:$4 sm:$0xff]   ;;  %v3173_v20 = vld [vmem:[%s3816_s24 + $0x3a0] ss:$16 sps:$4 sm:$0xff]  }
 0x367   : > { %1834 = vmatpush1.bf16.msra.mxu0 %v3087_v21  ;;  %1916 = vmatpush1.bf16.msra.mxu1 %v3088_v22  ;;  %v3176_v21 = vld [vmem:[%s3816_s24 + $0x3a8] ss:$16 sps:$4 sm:$0xff]   ;;  %v3181_v22 = vld [vmem:[%s3816_s24 + $0x3c4] ss:$16 sps:$4 sm:$0xff]  }
 0x368   : > { %1835 = vmatprep.subr.bf16.mxu0 %v3089_v23  ;;  %1917 = vmatprep.subr.bf16.mxu1 %v3091_v24  ;;  %v3184_v23 = vld [vmem:[%s3816_s24 + $0x3cc] ss:$16 sps:$4 sm:$0xff]   ;;  %v3179_v24 = vld [vmem:[%s3816_s24 + $0x3c0] ss:$16 sps:$4 sm:$0xff]  }
 0x36b   : > { %1836 = vmatpush1.bf16.msra.mxu0 %v3093_v25  ;;  %1918 = vmatpush1.bf16.msra.mxu1 %v3094_v26  ;;  %v3182_v25 = vld [vmem:[%s3816_s24 + $0x3c8] ss:$16 sps:$4 sm:$0xff]   ;;  %v3187_v26 = vld [vmem:[%s3816_s24 + $0x3e4] ss:$16 sps:$4 sm:$0xff]  }
 0x36c   : > { %1846 = vmatprep.subr.bf16.mxu0 %v3097_v27  ;;  %1928 = vmatprep.subr.bf16.mxu1 %v3100_v28  ;;  %v3190_v27 = vld [vmem:[%s3816_s24 + $0x3ec] ss:$16 sps:$4 sm:$0xff]   ;;  %v3185_v28 = vld [vmem:[%s3816_s24 + $0x3e0] ss:$16 sps:$4 sm:$0xff]  }
 0x36e   : > { %1838 = vmatmul.mubr.bf16.vlgmr.msra.gmra.mrb[0].mxu0 %v4017_v30  ;;  %1920 = vmatmul.mubr.bf16.vlgmr.msra.gmra.mrb[0].mxu1 %v4017_v30 }
 0x36f   : > { %1847 = vmatpush1.bf16.msra.mxu0 %v3095_v29  ;;  %1929 = vmatpush1.bf16.msra.mxu1 %v3098_v31  ;;  %v3188_v29 = vld [vmem:[%s3816_s24 + $0x3e8] ss:$16 sps:$4 sm:$0xff]   ;;  %v1159_v31 = vcombine.high %v4017_v30, %v4017_v30 }
 0x370   : > { %1848 = vmatprep.subr.bf16.mxu0 %v3103_v32  ;;  %1930 = vmatprep.subr.bf16.mxu1 %v3106_v33  ;;  %v3522_v32 = vmov 1983009808  }
 0x371   : > { %1878 = vmatprep.mubr.bf16.mxu0 %v1160_v34  ;;  %1960 = vmatprep.mubr.bf16.mxu1 %v1160_v34  ;;  %v1976_v33 = vunpack.c.l.s4 %v3522_v32 }
 0x373   : > { %1849 = vmatpush1.bf16.msra.mxu0 %v3101_v35  ;;  %1931 = vmatpush1.bf16.msra.mxu1 %v3104_v36  ;;  %v1977_v34 = vunpack.c.0.s8 %v1976_v33 }
 0x374   : > { %1850 = vmatprep.subr.bf16.mxu0 %v3109_v37  ;;  %1932 = vmatprep.subr.bf16.mxu1 %v3112_v38 }
 0x375   : > { %v4085_v37 = vsub.s32 %v1977_v34, %v3989_v1 }
 0x377   : > { %1851 = vmatpush1.bf16.msra.mxu0 %v3107_v39  ;;  %1933 = vmatpush1.bf16.msra.mxu1 %v3110_v40 }
 0x378   : > { %1852 = vmatprep.subr.bf16.mxu0 %v3115_v41  ;;  %1934 = vmatprep.subr.bf16.mxu1 %v3118_v42 }
 0x37b   : > { %1853 = vmatpush1.bf16.msra.mxu0 %v3113_v43  ;;  %1935 = vmatpush1.bf16.msra.mxu1 %v3116_v44 }
 0x37c   : > { %1854 = vmatprep.subr.bf16.mxu0 %v3121_v45  ;;  %1936 = vmatprep.subr.bf16.mxu1 %v3124_v46 }
 0x37f   : > { %1855 = vmatpush1.bf16.msra.mxu0 %v3119_v47  ;;  %1937 = vmatpush1.bf16.msra.mxu1 %v3122_v48  ;;  %v1004_v47 = vld [vmem:[#allocation3] sm:$0xff] }
 0x380   : > { %1856 = vmatprep.subr.bf16.mxu0 %v3127_v49  ;;  %1938 = vmatprep.subr.bf16.mxu1 %v3130_v50  ;;  %v3191_v50 = vld [vmem:[#allocation13 + $0x40] sm:$0xff] (!%p2711_p11)  }
 0x383   : > { %1857 = vmatpush1.bf16.msra.mxu0 %v3125_v51  ;;  %1939 = vmatpush1.bf16.msra.mxu1 %v3128_v52  ;;  %v3192_v51 = vld [vmem:[#allocation13 + $0xc0] sm:$0xff] (!%p2711_p11)  }
 0x384   : > { %1858 = vmatprep.subr.bf16.mxu0 %v3133_v53  ;;  %1940 = vmatprep.subr.bf16.mxu1 %v3136_v54  ;;  %v3193_v52 = vld [vmem:[#allocation13] sm:$0xff] (!%p2711_p11)   ;;  %v3195_v54 = vld [vmem:[#allocation13 + $0x48] sm:$0xff] (!%p2711_p11)  }
 0x385   : > { %v3194_v53 = vld [vmem:[#allocation13 + $0x80] sm:$0xff] (!%p2711_p11)  }
 0x387   : > { %1859 = vmatpush1.bf16.msra.mxu0 %v3131_v55  ;;  %1941 = vmatpush1.bf16.msra.mxu1 %v3134_v56  ;;  %v3196_v55 = vld [vmem:[#allocation13 + $0xc8] sm:$0xff] (!%p2711_p11)  }
 0x388   : > { %1860 = vmatprep.subr.bf16.mxu0 %v3139_v57  ;;  %1942 = vmatprep.subr.bf16.mxu1 %v3142_v59  ;;  %v3197_v56 = vld [vmem:[#allocation13 + $0x8] sm:$0xff] (!%p2711_p11)   ;;  %v3199_v59 = vld [vmem:[#allocation13 + $0x50] sm:$0xff] (!%p2711_p11)  }
 0x389   : > { %v3198_v57 = vld [vmem:[#allocation13 + $0x88] sm:$0xff] (!%p2711_p11)  }
 0x38b   : > { %1861 = vmatpush1.bf16.msra.mxu0 %v3137_v60  ;;  %1943 = vmatpush1.bf16.msra.mxu1 %v3140_v61  ;;  %v3200_v60 = vld [vmem:[#allocation13 + $0xd0] sm:$0xff] (!%p2711_p11)  }
 0x38c   : > { %1862 = vmatprep.subr.bf16.mxu0 %v3145_v62  ;;  %1944 = vmatprep.subr.bf16.mxu1 %v3148_v63  ;;  %v3201_v61 = vld [vmem:[#allocation13 + $0x10] sm:$0xff] (!%p2711_p11)   ;;  %v3203_v63 = vld [vmem:[#allocation13 + $0x58] sm:$0xff] (!%p2711_p11)  }
 0x38d   : > { %v3202_v62 = vld [vmem:[#allocation13 + $0x90] sm:$0xff] (!%p2711_p11)  }
 0x38f   : > { %1863 = vmatpush1.bf16.msra.mxu0 %v3143_v0  ;;  %1945 = vmatpush1.bf16.msra.mxu1 %v3146_v2  ;;  %v3204_v0 = vld [vmem:[#allocation13 + $0xd8] sm:$0xff] (!%p2711_p11)  }
 0x390   : > { %1864 = vmatprep.subr.bf16.mxu0 %v3151_v3  ;;  %1946 = vmatprep.subr.bf16.mxu1 %v3154_v4  ;;  %v3205_v2 = vld [vmem:[#allocation13 + $0x18] sm:$0xff] (!%p2711_p11)   ;;  %v3207_v4 = vld [vmem:[#allocation13 + $0x60] sm:$0xff] (!%p2711_p11)  }
 0x391   : > { %v3206_v3 = vld [vmem:[#allocation13 + $0x98] sm:$0xff] (!%p2711_p11)  }
 0x393   : > { %1865 = vmatpush1.bf16.msra.mxu0 %v3149_v5  ;;  %1947 = vmatpush1.bf16.msra.mxu1 %v3152_v58  ;;  %v3208_v5 = vld [vmem:[#allocation13 + $0xe0] sm:$0xff] (!%p2711_p11)  }
 0x394   : > { %1866 = vmatprep.subr.bf16.mxu0 %v3157_v6  ;;  %1948 = vmatprep.subr.bf16.mxu1 %v3160_v7  ;;  %v3209_v58 = vld [vmem:[#allocation13 + $0x20] sm:$0xff] (!%p2711_p11)   ;;  %v3211_v7 = vld [vmem:[#allocation13 + $0x68] sm:$0xff] (!%p2711_p11)  }
 0x395   : > { %v3210_v6 = vld [vmem:[#allocation13 + $0xa0] sm:$0xff] (!%p2711_p11)  }
 0x397   : > { %1867 = vmatpush1.bf16.msra.mxu0 %v3155_v8  ;;  %1949 = vmatpush1.bf16.msra.mxu1 %v3158_v9  ;;  %v3212_v8 = vld [vmem:[#allocation13 + $0xe8] sm:$0xff] (!%p2711_p11)  }
 0x398   : > { %1868 = vmatprep.subr.bf16.mxu0 %v3163_v10  ;;  %1950 = vmatprep.subr.bf16.mxu1 %v3166_v11  ;;  %v3213_v9 = vld [vmem:[#allocation13 + $0x28] sm:$0xff] (!%p2711_p11)   ;;  %v3215_v11 = vld [vmem:[#allocation13 + $0x70] sm:$0xff] (!%p2711_p11)  }
 0x399   : > { %v3214_v10 = vld [vmem:[#allocation13 + $0xa8] sm:$0xff] (!%p2711_p11)  }
 0x39b   : > { %1869 = vmatpush1.bf16.msra.mxu0 %v3161_v12  ;;  %1951 = vmatpush1.bf16.msra.mxu1 %v3164_v13  ;;  %v3216_v12 = vld [vmem:[#allocation13 + $0xf0] sm:$0xff] (!%p2711_p11)  }
 0x39c   : > { %1870 = vmatprep.subr.bf16.mxu0 %v3169_v14  ;;  %1952 = vmatprep.subr.bf16.mxu1 %v3172_v15  ;;  %v3217_v13 = vld [vmem:[#allocation13 + $0x30] sm:$0xff] (!%p2711_p11)   ;;  %v2002_v14 = vsub.s32 (!%p2711_p11), 0, %v3989_v1 }
 0x39d   : > { %v3218_v15 = vld [vmem:[#allocation13 + $0xb0] sm:$0xff] (!%p2711_p11)  }
 0x39f   : > { %1871 = vmatpush1.bf16.msra.mxu0 %v3167_v16  ;;  %1953 = vmatpush1.bf16.msra.mxu1 %v3170_v17  ;;  %v2006_v16 = vsub.s32 (!%p2711_p11), 1, %v3989_v1  ;;  %v3219_v17 = vld [vmem:[#allocation13 + $0x78] sm:$0xff] (!%p2711_p11)  }
 0x3a0   : > { %1872 = vmatprep.subr.bf16.mxu0 %v3175_v18  ;;  %1954 = vmatprep.subr.bf16.mxu1 %v3178_v19  ;;  %v2010_v18 = vsub.s32 (!%p2711_p11), 2, %v3989_v1  ;;  %v3220_v19 = vld [vmem:[#allocation13 + $0xf8] sm:$0xff] (!%p2711_p11)  }
 0x3a3   : > { %1873 = vmatpush1.bf16.msra.mxu0 %v3173_v20  ;;  %1955 = vmatpush1.bf16.msra.mxu1 %v3176_v21  ;;  %v2014_v20 = vsub.s32 (!%p2711_p11), 3, %v3989_v1  ;;  %v3221_v21 = vld [vmem:[#allocation13 + $0x38] sm:$0xff] (!%p2711_p11)  }
 0x3a4   : > { %1874 = vmatprep.subr.bf16.mxu0 %v3181_v22  ;;  %1956 = vmatprep.subr.bf16.mxu1 %v3184_v23  ;;  %v3222_v22 = vld [vmem:[#allocation13 + $0xb8] sm:$0xff] (!%p2711_p11)  }
 0x3a5   : > { %v1998_v23 = vld [vmem:[#allocation12] sm:$0xf] (!%p2711_p11) }
 0x3a7   : > { %1875 = vmatpush1.bf16.msra.mxu0 %v3179_v24  ;;  %1957 = vmatpush1.bf16.msra.mxu1 %v3182_v25  ;;  %v2003_v24 = vrot.slane (!%p2711_p11), %v1998_v23, %v2002_v14  ;;  %v2007_v25 = vrot.slane (!%p2711_p11), %v1998_v23, %v2006_v16 }
 0x3a8   : > { %1876 = vmatprep.subr.bf16.mxu0 %v3187_v26  ;;  %1958 = vmatprep.subr.bf16.mxu1 %v3190_v27  ;;  %v2011_v26 = vrot.slane (!%p2711_p11), %v1998_v23, %v2010_v18  ;;  %v2015_v27 = vrot.slane (!%p2711_p11), %v1998_v23, %v2014_v20 }
 0x3ab   : > { %1877 = vmatpush1.bf16.msra.mxu0 %v3185_v28  ;;  %1959 = vmatpush1.bf16.msra.mxu1 %v3188_v29  ;;  %v2016_v28 = vcombine.low (!%p2711_p11), %v2003_v24, %v2007_v25  ;;  %v2017_v29 = vcombine.low (!%p2711_p11), %v2011_v26, %v2015_v27 }
 0x3ac   : > { %2768 = vmatprep.subr.bf16.mxu0 (!%p2711_p11), %v3191_v50  ;;  %2790 = vmatprep.subr.bf16.mxu1 (!%p2711_p11), %v3192_v51 }
 0x3ad   : > { %v2031_v32 = vrot.slane (!%p2711_p11), %v2017_v29, %v4085_v37 }
 0x3ae   : > { %1879 = vmatmul.mubr.bf16.vlgmr.msra.gmra.mrb[0].mxu0 %v1159_v31  ;;  %1961 = vmatmul.mubr.bf16.vlgmr.msra.gmra.mrb[0].mxu1 %v1159_v31  ;;  %v2024_v31 = vrot.slane (!%p2711_p11), %v2016_v28, %v4085_v37 }
 0x3af   : > { %2769 = vmatpush3.bf16.msra.mxu0 (!%p2711_p11), %v3193_v52  ;;  %2791 = vmatpush3.bf16.msra.mxu1 (!%p2711_p11), %v3194_v53 }
 0x3b0   : > { %2770 = vmatprep.subr.bf16.mxu0 (!%p2711_p11), %v3195_v54  ;;  %2792 = vmatprep.subr.bf16.mxu1 (!%p2711_p11), %v3196_v55  ;;  %v2032_v34 = vcombine.low (!%p2711_p11), %v2024_v31, %v2031_v32 }
 0x3b3   : > { %2771 = vmatpush3.bf16.msra.mxu0 (!%p2711_p11), %v3197_v56  ;;  %2793 = vmatpush3.bf16.msra.mxu1 (!%p2711_p11), %v3198_v57 }
 0x3b4   : > { %2772 = vmatprep.subr.bf16.mxu0 (!%p2711_p11), %v3199_v59  ;;  %2794 = vmatprep.subr.bf16.mxu1 (!%p2711_p11), %v3200_v60 }
 0x3b7   : > { %2773 = vmatpush3.bf16.msra.mxu0 (!%p2711_p11), %v3201_v61  ;;  %2795 = vmatpush3.bf16.msra.mxu1 (!%p2711_p11), %v3202_v62 }
 0x3b8   : > { %2774 = vmatprep.subr.bf16.mxu0 (!%p2711_p11), %v3203_v63  ;;  %2796 = vmatprep.subr.bf16.mxu1 (!%p2711_p11), %v3204_v0 }
 0x3bb   : > { %2775 = vmatpush3.bf16.msra.mxu0 (!%p2711_p11), %v3205_v2  ;;  %2797 = vmatpush3.bf16.msra.mxu1 (!%p2711_p11), %v3206_v3 }
 0x3bc   : > { %2776 = vmatprep.subr.bf16.mxu0 (!%p2711_p11), %v3207_v4  ;;  %2798 = vmatprep.subr.bf16.mxu1 (!%p2711_p11), %v3208_v5 }
 0x3bf   : > { %2777 = vmatpush3.bf16.msra.mxu0 (!%p2711_p11), %v3209_v58  ;;  %2799 = vmatpush3.bf16.msra.mxu1 (!%p2711_p11), %v3210_v6 }
 0x3c0   : > { %2778 = vmatprep.subr.bf16.mxu0 (!%p2711_p11), %v3211_v7  ;;  %2800 = vmatprep.subr.bf16.mxu1 (!%p2711_p11), %v3212_v8 }
 0x3c3   : > { %2779 = vmatpush3.bf16.msra.mxu0 (!%p2711_p11), %v3213_v9  ;;  %2801 = vmatpush3.bf16.msra.mxu1 (!%p2711_p11), %v3214_v10 }
 0x3c4   : > { %2780 = vmatprep.subr.bf16.mxu0 (!%p2711_p11), %v3215_v11  ;;  %2802 = vmatprep.subr.bf16.mxu1 (!%p2711_p11), %v3216_v12 }
 0x3c7   : > { %2781 = vmatpush3.bf16.msra.mxu0 (!%p2711_p11), %v3217_v13  ;;  %2803 = vmatpush3.bf16.msra.mxu1 (!%p2711_p11), %v3218_v15 }
 0x3c8   : > { %2782 = vmatprep.subr.bf16.mxu0 (!%p2711_p11), %v3219_v17  ;;  %2804 = vmatprep.subr.bf16.mxu1 (!%p2711_p11), %v3220_v19 }
 0x3cb   : > { %2783 = vmatpush3.bf16.msra.mxu0 (!%p2711_p11), %v3221_v21  ;;  %2805 = vmatpush3.bf16.msra.mxu1 (!%p2711_p11), %v3222_v22 }
 0x481   : > { %v1880_v35 = vpop.f32.mrb[0].mxu0  ;;  %v1962_v36 = vpop.f32.mrb[0].mxu1 }
 0x482   : > { %v1882_v38 = vpop.f32.mrb[1].mxu0  ;;  %v1964_v39 = vpop.f32.mrb[1].mxu1 }
 0x483   : > { %v1973_v40 = vcombine.low %v1880_v35, %v1882_v38  ;;  %v1974_v41 = vcombine.low %v1962_v36, %v1964_v39  ;;  %v1884_v42 = vpop.f32.mrb[2].mxu0  ;;  %v1966_v43 = vpop.f32.mrb[2].mxu1 }
 0x484   : > { %v1885_v44 = vpop.f32.mrb[3].mxu0  ;;  %v1967_v30 = vpop.f32.mrb[3].mxu1 }
 0x485   : > { %v1981_v45 = vrot.slane %v1973_v40, %v4085_v37  ;;  %v1988_v46 = vrot.slane %v1974_v41, %v4085_v37  ;;  %1996 = sbr.rel (%p2711_p11) target bundleno = 1716 (0x6b4), region = 92 }
 0x487   : > { %v1989_v48 = vcombine.low %v1981_v45, %v1988_v46  ;;  %v2712_v46 = vld [vmem:[#allocation15] ss:$0 sm:$0xff] (!%p2711_p11) }
 0x489   : > { %v1991_v49 = vadd.f32 %v1989_v48, %v1004_v47 }
 0x48b   : > { %1992 = vst [vmem:[#allocation3] sm:$0xff] %v1991_v49 }
 0x492   : > { %v1997_v33 = vld [vmem:[#allocation3] sm:$0xff] }
 0x493   : > { %v2034_v1 = vadd.f32 %v2032_v34, %v1997_v33 }
 0x495   : > { %v2035_v35 = vmax.f32 %v2034_v1, 0.0 }
 0x497   : > { %v2044_v36 = vrot.slane %v2035_v35, %v4085_v37  ;;  %v2037_v38 = vcombine.high %v2035_v35, %v2035_v35 }
 0x499   : > { %v2052_v39 = vcombine.high %v2044_v36, %v2044_v36  ;;  %v2051_v40 = vrot.slane %v2037_v38, %v4085_v37  ;;  %v2058_v41 = vpack.c.bf16 %v2044_v36, %v2044_v36 }
 0x49b   : > { %v2059_v42 = vpack.c.bf16 %v2052_v39, %v2052_v39  ;;  %v2053_v43 = vcombine.high %v2051_v40, %v2051_v40  ;;  %v2060_v44 = vpack.c.bf16 %v2051_v40, %v2051_v40 }
 0x49d   : > { %2357 = vmatprep.mubr.bf16.mxu0 %v2059_v42  ;;  %v2061_v30 = vpack.c.bf16 %v2053_v43, %v2053_v43 }
 0x49e   : > { %2358 = vmatmul.mubr.bf16.vlgmr.msra.gmra.mrb[0].mxu0 %v2058_v41 }
 0x49f   : > { %2397 = vmatprep.mubr.bf16.mxu1 %v2061_v30 }
 0x4a0   : > { %2398 = vmatmul.mubr.bf16.vlgmr.msra.gmra.mrb[0].mxu1 %v2060_v44 }
 0x571   : > { %v2784_v45 = vpop.f32.mrb[0].mxu0 }
 0x572   : > { %v2785_v47 = vpop.f32.mrb[1].mxu0 }
 0x573   : > { %v2806_v48 = vpop.f32.mrb[0].mxu1  ;;  %v2786_v49 = vadd.f32 %v2785_v47, %v2784_v45  ;;  %v2787_v50 = vpop.f32.mrb[2].mxu0 }
 0x574   : > { %v2807_v51 = vpop.f32.mrb[1].mxu1  ;;  %v2788_v52 = vpop.f32.mrb[3].mxu0 }
 0x575   : > { %v2360_v53 = vadd.f32 %v2786_v49, %v2712_v46  ;;  %v2808_v54 = vadd.f32 %v2807_v51, %v2806_v48  ;;  %v2809_v37 = vpop.f32.mrb[2].mxu1 }
 0x576   : > { %v2810_v55 = vpop.f32.mrb[3].mxu1 }
 0x577   : > { %v2400_v56 = vadd.f32 %v2808_v54, %v2360_v53 }
 0x579   : > { %v2406_v57 = vsel %vm2405_vm3, %v2400_v56, -inf }
 0x57a   : > { %2407 = vmax.xlane.f32.xlu0 %v2406_v57 }
 0x607   : > { %v2408_v59 = vpop.xlane.xlu0 %2407 }
 0x608   : > { %v2409_v60 = vsub.f32 %v2400_v56, %v2408_v59 }
 0x60a   : > { %v2410_v61 = vmul.f32 1.442695, %v2409_v60 }
 0x60c   : > { %3223 = vpow2.f32 %v2410_v61 }
 0x616   : > { %v3224_v62 = vpop.eup %3223 }
 0x617   : > { %v2412_v63 = vsel %vm2405_vm3, %v3224_v62, 0.0 }
 0x618   : > { %2413 = vadd.xlane.f32.xlu0 %v2412_v63 }
 0x6a5   : > { %v2414_v0 = vpop.xlane.xlu0 %2413 }
 0x6a6   : > { %3225 = vrcp.f32 %v2414_v0 }
 0x6b0   : > { %v3226_v2 = vpop.eup %3225 }
 0x6b1   : > { %v2416_v3 = vmul.f32 %v3226_v2, %v3224_v62 }
 0x6b3   : > { %2417 = vst [vmem:[#allocation16] sm:$0x3] %v2416_v3 }
 0x6b4 PF: > { %p2936_p5 = scmp.eq.s32.totalorder %s3595_s15, 3  ;;  %s3523_s24 = smov [#allocation16]  }
 0x6b5   : > { %s2425_s21 = sshll.u32 %s3523_s24, 4  ;;  %s2426_s21 = int_to_ptr.vmem [resolvable:$true] %s2425_s21 }
 0x6b6   : > { %s3425_s2 = scalar_lea.vmem %s2426_s21, 32  ;;  %p3432_p2 = scmp.lt.s32.totalorder %s2426_s21, %s2426_s21 }
 0x6b7   : > { %p3426_p8 = scmp.ne.s32.totalorder %s2426_s21, %s3425_s2  ;;  %p3433_p9 = scmp.lt.s32.totalorder %s3425_s2, %s3425_s2 }
 0x6b9   : > { %p3427_p7 = pnand %p3426_p8, %p2936_p5  ;;  %p3434_p3 = por %p3433_p9, %p3432_p2 }
 0x6bb   : > { %p3428_p13 = pneg %p3427_p7 }
 0x6bd   : > { %p3435_p1 = pnand %p3434_p3, %p3428_p13 }
 0x6bf   : > { %3438 = shalt.err (!%p3435_p1)
}
 0x6c0   : > { %s4168_s9 = sld [smem:[#allocation25_spill]] }
 0x6c6   : > { %s3439_s30 = scalar_lea.hbm %s4168_s9, 32 }
 0x6c7   : > { %p3440_p6 = scmp.ne.s32.totalorder %s4168_s9, %s3439_s30  ;;  %p3445_p12 = scmp.lt.u32.totalorder %s3439_s30, %s4168_s9 }
 0x6c9   : > { %p3441_p4 = pnand %p3440_p6, %p2936_p5 }
 0x6cb   : > { %p3442_p10 = pneg %p3441_p4 }
 0x6cd   : > { %p3447_p0 = pnand %p3445_p12, %p3442_p10 }
 0x6cf   : > { %3450 = shalt.err (!%p3447_p0)
}
 0x6d0   : > { %2897 = dma.vmem_to_hbm [thread:$0]  (%p2936_p5), %s2426_s21, 32, %s4168_s9, [#allocation6]  }
 0x6d1   : > { %3488 = dma.done.wait (%p2936_p5), [#allocation6], 32  }
 0x6d2   : > { %3490 = vsyncadd (%p2936_p5), [#allocation6], 4294967264 }
 0x6d3 PF: > { %p23_p11 = scmp.ge.s32.totalorder %s3742_s27, 6   ;;  %s4169_s30 = smov %s3497_s10 }
 0x6d4   : > { %s4170_s10 = smov %s3501_s11  ;;  %s4171_s11 = smov %s3754_s14 }
 0x6d5   : > { %s4172_s12 = smov %s3742_s27  ;;  %25 = sbr.rel (!%p23_p11) target bundleno = 11 (0xb), region = 130 }
 0x6dc   :  { %2438 = vsyncpa [#allocation5], 1 }
 0x6dd   :  { %2440 = vsyncpa [#allocation5 + $0x1], 1 }
 0x6de   :  { %2441 = vsyncpa [#allocation8], 1 }
 0x6df   :  { %2442 = vsyncpa [#allocation11], 1 }
 0x6e0   :  { %2444 = vsyncpa [#allocation11 + $0x1], 1 }
 0x6e1   :  { %2445 = vsyncpa [#allocation14], 1 }
 0x6e2   :  { %2446 = vsyncpa [#allocation6], 1 }
 0x6e3   :  { %2448 = vsyncpa [#allocation6 + $0x1], 1 }

</bundles_post_ra>
